<compile_context>
chip_gen: v7x
topology: tpu7x:2x2x1
jax: 0.10.0
libtpu: 0.0.40
codegen_flags: <defaults>
</compile_context>

<pallas_src>
import functools

import jax
import jax.numpy as jnp
from jax.experimental import pallas as pl
from jax.experimental.pallas import tpu as pltpu


# ---------------------------------------------------------------------------
# Kernel: per (batch, row-tile) grid step, gather the KH*KW shifted patches
# from the VMEM-resident padded image and accumulate KH*KW small MXU matmuls
# into an f32 accumulator; fused bias add (+ optional ReLU); lane-dense store.
# ---------------------------------------------------------------------------
def _conv_kernel(x_ref, w_ref, b_ref, o_ref, *, stride, apply_relu):
    # x_ref: (1, Hp, Wp, Cin)      padded input image (channels-last, bf16)
    # w_ref: (KH, KW, Cin, Fp)     weights, Fp padded to a multiple of 128
    # b_ref: (1, Fp)               bias row (f32)
    # o_ref: (1, TH, OW, Fp)       output tile
    _, th, ow, fp = o_ref.shape
    kh, kw, cin, _ = w_ref.shape

    row0 = pl.program_id(1) * (th * stride)   # first input row of this tile

    acc = jnp.zeros((th * ow, fp), jnp.float32)
    for ki in range(kh):
        # row band for kernel-row ki (th output rows)
        if stride == 1:
            band = x_ref[0, pl.ds(row0 + ki, th), :, :]
        else:
            band = x_ref[0, pl.ds(row0 + ki, th, stride), :, :]
        for kj in range(kw):
            if stride == 1:
                patch = band[:, kj:kj + ow, :]
            else:
                patch = band[:, kj:kj + (ow - 1) * stride + 1:stride, :]
            lhs = patch.reshape(th * ow, cin)
            acc += jnp.dot(lhs, w_ref[ki, kj, :, :],
                           preferred_element_type=jnp.float32)

    acc = acc + b_ref[...]
    if apply_relu:
        acc = jnp.maximum(acc, 0.0)
    o_ref[...] = acc.reshape(o_ref.shape).astype(o_ref.dtype)


def _pick_row_tile(oh, ow, target_rows=512):
    """Largest divisor `th` of OH such that th*OW <= max(target_rows, OW)."""
    cap = max(target_rows, ow)
    best = 1
    for th in range(1, oh + 1):
        if oh % th == 0 and th * ow <= cap:
            best = th
    return best


def conv_forward(x_nchw, weight, bias=None, *, stride=1, padding=0, act=False,
                 bn_params=None, compute_dtype=jnp.bfloat16, target_gemm_rows=512):
    """Forward pass of `Conv`.

    x_nchw: (N, C_in, H, W)   weight: (F, C_in, KH, KW)   bias: (F,) or None
    bn_params: optional (gamma, beta, running_mean, running_var, eps) — eval-mode
               BatchNorm folded into weight/bias at trace time.
    Returns (N, F, OH, OW), matching PyTorch nn.Conv2d (+BN eval +ReLU) semantics.
    """
    N, Cin, H, W = x_nchw.shape
    F, Cin_w, KH, KW = weight.shape
    assert Cin_w == Cin, "grouped conv not supported"
    out_dtype = x_nchw.dtype

    w = weight.astype(jnp.float32)
    b = jnp.zeros((F,), jnp.float32) if bias is None else bias.astype(jnp.float32)
    if bn_params is not None:
        # TODO(synk): training-mode BatchNorm (batch statistics) not implemented;
        # eval-mode running-stats BN is folded into w/b here.
        gamma, beta, mean, var, eps = bn_params
        scale = gamma.astype(jnp.float32) * jax.lax.rsqrt(var.astype(jnp.float32) + eps)
        w = w * scale.reshape(F, 1, 1, 1)
        b = (b - mean.astype(jnp.float32)) * scale + beta.astype(jnp.float32)

    OH = (H + 2 * padding - KH) // stride + 1
    OW = (W + 2 * padding - KW) // stride + 1

    # channels-last + small spatial halo pad (avoids in-kernel boundary masking)
    x_nhwc = jnp.transpose(x_nchw, (0, 2, 3, 1)).astype(compute_dtype)
    x_pad = jnp.pad(x_nhwc, ((0, 0), (padding, padding), (padding, padding), (0, 0)))
    Hp, Wp = H + 2 * padding, W + 2 * padding

    # weight -> (KH, KW, Cin, Fp) with lane-dense Fp (multiple of 128)
    Fp = ((F + 127) // 128) * 128
    w_k = jnp.transpose(w, (2, 3, 1, 0))                         # (KH, KW, Cin, F)
    w_k = jnp.pad(w_k, ((0, 0), (0, 0), (0, 0), (0, Fp - F))).astype(compute_dtype)
    b_k = jnp.pad(b, (0, Fp - F)).reshape(1, Fp)                 # f32

    th = _pick_row_tile(OH, OW, target_gemm_rows)
    grid = (N, OH // th)

    kernel = functools.partial(_conv_kernel, stride=stride, apply_relu=act)
    out_nhwf = pl.pallas_call(
        kernel,
        out_shape=jax.ShapeDtypeStruct((N, OH, OW, Fp), out_dtype),
        grid_spec=pltpu.PrefetchScalarGridSpec(
            num_scalar_prefetch=0,
            grid=grid,
            in_specs=[
                # full padded image of batch n stays resident across row tiles
                pl.BlockSpec((1, Hp, Wp, Cin), lambda n, i: (n, 0, 0, 0)),
                # weights + bias resident across the whole grid
                pl.BlockSpec((KH, KW, Cin, Fp), lambda n, i: (0, 0, 0, 0)),
                pl.BlockSpec((1, Fp), lambda n, i: (0, 0)),
            ],
            out_specs=pl.BlockSpec((1, th, OW, Fp), lambda n, i: (n, i, 0, 0)),
        ),
        compiler_params=pltpu.CompilerParams(
            dimension_semantics=("parallel", "parallel"),
        ),
    )(x_pad, w_k, b_k)

    out = out_nhwf[:, :, :, :F]                 # drop lane padding
    return jnp.transpose(out, (0, 3, 1, 2))     # back to NCHW


if __name__ == "__main__":
    # Module config: Conv(input_channels=4, n_feats=8, kernel_size=3, stride=1,
    #                     padding=1, bias=True, bn=False, act=False)
    key = jax.random.PRNGKey(0)
    kx, kw, kb = jax.random.split(key, 3)

    N, Cin, H, W = 2, 4, 16, 16
    F, KH, KW = 8, 3, 3
    stride, padding = 1, 1

    x = jax.random.normal(kx, (N, Cin, H, W), dtype=jnp.float32)
    fan_in = Cin * KH * KW
    bound = 1.0 / (fan_in ** 0.5)
    weight = jax.random.uniform(kw, (F, Cin, KH, KW), minval=-bound, maxval=bound,
                                dtype=jnp.float32)
    bias = jax.random.uniform(kb, (F,), minval=-bound, maxval=bound, dtype=jnp.float32)

    out = conv_forward(x, weight, bias, stride=stride, padding=padding, act=False)
    out = jax.block_until_ready(out)

    # correctness check vs. XLA conv on the same bf16-quantized operands
    xq = x.astype(jnp.bfloat16).astype(jnp.float32)
    wq = weight.astype(jnp.bfloat16).astype(jnp.float32)
    ref = jax.lax.conv_general_dilated(
        xq, wq, window_strides=(stride, stride),
        padding=[(padding, padding), (padding, padding)],
        dimension_numbers=("NCHW", "OIHW", "NCHW"),
    ) + bias.reshape(1, F, 1, 1)

    assert out.shape == (N, F, H, W)
    assert jnp.allclose(out, ref, atol=2e-3, rtol=2e-3)

    print("KERNEL_OK")
</pallas_src>

<mosaic_0001>
module attributes {stable_mosaic.version = 11 : i64} {
  func.func @_conv_kernel(%arg0: i32, %arg1: i32, %arg2: memref<1x18x18x4xbf16, #tpu.memory_space<vmem>>, %arg3: memref<3x3x4x128xbf16, #tpu.memory_space<vmem>>, %arg4: memref<1x128xf32, #tpu.memory_space<vmem>>, %arg5: memref<1x16x16x128xf32, #tpu.memory_space<vmem>>) attributes {dimension_semantics = [#tpu.dimension_semantics<parallel>, #tpu.dimension_semantics<parallel>], iteration_bounds = array<i64: 2, 1>, scalar_prefetch = 0 : i64, scratch_operands = 0 : i64, tpu.core_type = #tpu.core_type<tc>, window_params = [{transform_indices = @transform_0, window_bounds = array<i64: 1, 18, 18, 4>}, {pipeline_mode = #tpu.pipeline_mode<synchronous>, transform_indices = @transform_1, window_bounds = array<i64: 3, 3, 4, 128>}, {pipeline_mode = #tpu.pipeline_mode<synchronous>, transform_indices = @transform_2, window_bounds = array<i64: 1, 128>}, {transform_indices = @transform_3, window_bounds = array<i64: 1, 16, 16, 128>}]} {
    %c16_i32 = arith.constant 16 : i32
    %0 = arith.muli %arg1, %c16_i32 : i32
    %cst = arith.constant 0.000000e+00 : f32
    %1 = vector.broadcast %cst : f32 to vector<256x128xf32>
    %c0_i32 = arith.constant 0 : i32
    %2 = arith.addi %0, %c0_i32 : i32
    %c0 = arith.constant 0 : index
    %3 = arith.index_cast %2 : i32 to index
    %c0_0 = arith.constant 0 : index
    %c0_1 = arith.constant 0 : index
    %4 = vector.load %arg2[%c0, %3, %c0_0, %c0_1] : memref<1x18x18x4xbf16, #tpu.memory_space<vmem>>, vector<1x16x18x4xbf16>
    %5 = vector.shape_cast %4 : vector<1x16x18x4xbf16> to vector<16x18x4xbf16>
    %6 = vector.extract_strided_slice %5 {offsets = [0, 0, 0], sizes = [16, 16, 4], strides = [1, 1, 1]} : vector<16x18x4xbf16> to vector<16x16x4xbf16>
    %7 = vector.shape_cast %6 : vector<16x16x4xbf16> to vector<256x4xbf16>
    %c0_2 = arith.constant 0 : index
    %c0_3 = arith.constant 0 : index
    %c0_4 = arith.constant 0 : index
    %c0_5 = arith.constant 0 : index
    %8 = vector.load %arg3[%c0_2, %c0_3, %c0_4, %c0_5] : memref<3x3x4x128xbf16, #tpu.memory_space<vmem>>, vector<1x1x4x128xbf16>
    %9 = vector.shape_cast %8 : vector<1x1x4x128xbf16> to vector<4x128xbf16>
    %cst_6 = arith.constant dense<0.000000e+00> : vector<256x128xf32>
    %10 = tpu.matmul %7, %9, %cst_6 {dimension_numbers = #tpu.dot_dimension_numbers<[1], [0], [0], [1], [0, 0, 1, 1], [], []>} : vector<256x4xbf16>, vector<4x128xbf16>, vector<256x128xf32> -> vector<256x128xf32>
    %11 = arith.addf %1, %10 : vector<256x128xf32>
    %12 = vector.extract_strided_slice %5 {offsets = [0, 1, 0], sizes = [16, 16, 4], strides = [1, 1, 1]} : vector<16x18x4xbf16> to vector<16x16x4xbf16>
    %13 = vector.shape_cast %12 : vector<16x16x4xbf16> to vector<256x4xbf16>
    %c0_7 = arith.constant 0 : index
    %c1 = arith.constant 1 : index
    %c0_8 = arith.constant 0 : index
    %c0_9 = arith.constant 0 : index
    %14 = vector.load %arg3[%c0_7, %c1, %c0_8, %c0_9] : memref<3x3x4x128xbf16, #tpu.memory_space<vmem>>, vector<1x1x4x128xbf16>
    %15 = vector.shape_cast %14 : vector<1x1x4x128xbf16> to vector<4x128xbf16>
    %cst_10 = arith.constant dense<0.000000e+00> : vector<256x128xf32>
    %16 = tpu.matmul %13, %15, %cst_10 {dimension_numbers = #tpu.dot_dimension_numbers<[1], [0], [0], [1], [0, 0, 1, 1], [], []>} : vector<256x4xbf16>, vector<4x128xbf16>, vector<256x128xf32> -> vector<256x128xf32>
    %17 = arith.addf %11, %16 : vector<256x128xf32>
    %18 = vector.extract_strided_slice %5 {offsets = [0, 2, 0], sizes = [16, 16, 4], strides = [1, 1, 1]} : vector<16x18x4xbf16> to vector<16x16x4xbf16>
    %19 = vector.shape_cast %18 : vector<16x16x4xbf16> to vector<256x4xbf16>
    %c0_11 = arith.constant 0 : index
    %c2 = arith.constant 2 : index
    %c0_12 = arith.constant 0 : index
    %c0_13 = arith.constant 0 : index
    %20 = vector.load %arg3[%c0_11, %c2, %c0_12, %c0_13] : memref<3x3x4x128xbf16, #tpu.memory_space<vmem>>, vector<1x1x4x128xbf16>
    %21 = vector.shape_cast %20 : vector<1x1x4x128xbf16> to vector<4x128xbf16>
    %cst_14 = arith.constant dense<0.000000e+00> : vector<256x128xf32>
    %22 = tpu.matmul %19, %21, %cst_14 {dimension_numbers = #tpu.dot_dimension_numbers<[1], [0], [0], [1], [0, 0, 1, 1], [], []>} : vector<256x4xbf16>, vector<4x128xbf16>, vector<256x128xf32> -> vector<256x128xf32>
    %23 = arith.addf %17, %22 : vector<256x128xf32>
    %c1_i32 = arith.constant 1 : i32
    %24 = arith.addi %0, %c1_i32 : i32
    %c0_15 = arith.constant 0 : index
    %25 = arith.index_cast %24 : i32 to index
    %c0_16 = arith.constant 0 : index
    %c0_17 = arith.constant 0 : index
    %26 = vector.load %arg2[%c0_15, %25, %c0_16, %c0_17] : memref<1x18x18x4xbf16, #tpu.memory_space<vmem>>, vector<1x16x18x4xbf16>
    %27 = vector.shape_cast %26 : vector<1x16x18x4xbf16> to vector<16x18x4xbf16>
    %28 = vector.extract_strided_slice %27 {offsets = [0, 0, 0], sizes = [16, 16, 4], strides = [1, 1, 1]} : vector<16x18x4xbf16> to vector<16x16x4xbf16>
    %29 = vector.shape_cast %28 : vector<16x16x4xbf16> to vector<256x4xbf16>
    %c1_18 = arith.constant 1 : index
    %c0_19 = arith.constant 0 : index
    %c0_20 = arith.constant 0 : index
    %c0_21 = arith.constant 0 : index
    %30 = vector.load %arg3[%c1_18, %c0_19, %c0_20, %c0_21] : memref<3x3x4x128xbf16, #tpu.memory_space<vmem>>, vector<1x1x4x128xbf16>
    %31 = vector.shape_cast %30 : vector<1x1x4x128xbf16> to vector<4x128xbf16>
    %cst_22 = arith.constant dense<0.000000e+00> : vector<256x128xf32>
    %32 = tpu.matmul %29, %31, %cst_22 {dimension_numbers = #tpu.dot_dimension_numbers<[1], [0], [0], [1], [0, 0, 1, 1], [], []>} : vector<256x4xbf16>, vector<4x128xbf16>, vector<256x128xf32> -> vector<256x128xf32>
    %33 = arith.addf %23, %32 : vector<256x128xf32>
    %34 = vector.extract_strided_slice %27 {offsets = [0, 1, 0], sizes = [16, 16, 4], strides = [1, 1, 1]} : vector<16x18x4xbf16> to vector<16x16x4xbf16>
    %35 = vector.shape_cast %34 : vector<16x16x4xbf16> to vector<256x4xbf16>
    %c1_23 = arith.constant 1 : index
    %c1_24 = arith.constant 1 : index
    %c0_25 = arith.constant 0 : index
    %c0_26 = arith.constant 0 : index
    %36 = vector.load %arg3[%c1_23, %c1_24, %c0_25, %c0_26] : memref<3x3x4x128xbf16, #tpu.memory_space<vmem>>, vector<1x1x4x128xbf16>
    %37 = vector.shape_cast %36 : vector<1x1x4x128xbf16> to vector<4x128xbf16>
    %cst_27 = arith.constant dense<0.000000e+00> : vector<256x128xf32>
    %38 = tpu.matmul %35, %37, %cst_27 {dimension_numbers = #tpu.dot_dimension_numbers<[1], [0], [0], [1], [0, 0, 1, 1], [], []>} : vector<256x4xbf16>, vector<4x128xbf16>, vector<256x128xf32> -> vector<256x128xf32>
    %39 = arith.addf %33, %38 : vector<256x128xf32>
    %40 = vector.extract_strided_slice %27 {offsets = [0, 2, 0], sizes = [16, 16, 4], strides = [1, 1, 1]} : vector<16x18x4xbf16> to vector<16x16x4xbf16>
    %41 = vector.shape_cast %40 : vector<16x16x4xbf16> to vector<256x4xbf16>
    %c1_28 = arith.constant 1 : index
    %c2_29 = arith.constant 2 : index
    %c0_30 = arith.constant 0 : index
    %c0_31 = arith.constant 0 : index
    %42 = vector.load %arg3[%c1_28, %c2_29, %c0_30, %c0_31] : memref<3x3x4x128xbf16, #tpu.memory_space<vmem>>, vector<1x1x4x128xbf16>
    %43 = vector.shape_cast %42 : vector<1x1x4x128xbf16> to vector<4x128xbf16>
    %cst_32 = arith.constant dense<0.000000e+00> : vector<256x128xf32>
    %44 = tpu.matmul %41, %43, %cst_32 {dimension_numbers = #tpu.dot_dimension_numbers<[1], [0], [0], [1], [0, 0, 1, 1], [], []>} : vector<256x4xbf16>, vector<4x128xbf16>, vector<256x128xf32> -> vector<256x128xf32>
    %45 = arith.addf %39, %44 : vector<256x128xf32>
    %c2_i32 = arith.constant 2 : i32
    %46 = arith.addi %0, %c2_i32 : i32
    %c0_33 = arith.constant 0 : index
    %47 = arith.index_cast %46 : i32 to index
    %c0_34 = arith.constant 0 : index
    %c0_35 = arith.constant 0 : index
    %48 = vector.load %arg2[%c0_33, %47, %c0_34, %c0_35] : memref<1x18x18x4xbf16, #tpu.memory_space<vmem>>, vector<1x16x18x4xbf16>
    %49 = vector.shape_cast %48 : vector<1x16x18x4xbf16> to vector<16x18x4xbf16>
    %50 = vector.extract_strided_slice %49 {offsets = [0, 0, 0], sizes = [16, 16, 4], strides = [1, 1, 1]} : vector<16x18x4xbf16> to vector<16x16x4xbf16>
    %51 = vector.shape_cast %50 : vector<16x16x4xbf16> to vector<256x4xbf16>
    %c2_36 = arith.constant 2 : index
    %c0_37 = arith.constant 0 : index
    %c0_38 = arith.constant 0 : index
    %c0_39 = arith.constant 0 : index
    %52 = vector.load %arg3[%c2_36, %c0_37, %c0_38, %c0_39] : memref<3x3x4x128xbf16, #tpu.memory_space<vmem>>, vector<1x1x4x128xbf16>
    %53 = vector.shape_cast %52 : vector<1x1x4x128xbf16> to vector<4x128xbf16>
    %cst_40 = arith.constant dense<0.000000e+00> : vector<256x128xf32>
    %54 = tpu.matmul %51, %53, %cst_40 {dimension_numbers = #tpu.dot_dimension_numbers<[1], [0], [0], [1], [0, 0, 1, 1], [], []>} : vector<256x4xbf16>, vector<4x128xbf16>, vector<256x128xf32> -> vector<256x128xf32>
    %55 = arith.addf %45, %54 : vector<256x128xf32>
    %56 = vector.extract_strided_slice %49 {offsets = [0, 1, 0], sizes = [16, 16, 4], strides = [1, 1, 1]} : vector<16x18x4xbf16> to vector<16x16x4xbf16>
    %57 = vector.shape_cast %56 : vector<16x16x4xbf16> to vector<256x4xbf16>
    %c2_41 = arith.constant 2 : index
    %c1_42 = arith.constant 1 : index
    %c0_43 = arith.constant 0 : index
    %c0_44 = arith.constant 0 : index
    %58 = vector.load %arg3[%c2_41, %c1_42, %c0_43, %c0_44] : memref<3x3x4x128xbf16, #tpu.memory_space<vmem>>, vector<1x1x4x128xbf16>
    %59 = vector.shape_cast %58 : vector<1x1x4x128xbf16> to vector<4x128xbf16>
    %cst_45 = arith.constant dense<0.000000e+00> : vector<256x128xf32>
    %60 = tpu.matmul %57, %59, %cst_45 {dimension_numbers = #tpu.dot_dimension_numbers<[1], [0], [0], [1], [0, 0, 1, 1], [], []>} : vector<256x4xbf16>, vector<4x128xbf16>, vector<256x128xf32> -> vector<256x128xf32>
    %61 = arith.addf %55, %60 : vector<256x128xf32>
    %62 = vector.extract_strided_slice %49 {offsets = [0, 2, 0], sizes = [16, 16, 4], strides = [1, 1, 1]} : vector<16x18x4xbf16> to vector<16x16x4xbf16>
    %63 = vector.shape_cast %62 : vector<16x16x4xbf16> to vector<256x4xbf16>
    %c2_46 = arith.constant 2 : index
    %c2_47 = arith.constant 2 : index
    %c0_48 = arith.constant 0 : index
    %c0_49 = arith.constant 0 : index
    %64 = vector.load %arg3[%c2_46, %c2_47, %c0_48, %c0_49] : memref<3x3x4x128xbf16, #tpu.memory_space<vmem>>, vector<1x1x4x128xbf16>
    %65 = vector.shape_cast %64 : vector<1x1x4x128xbf16> to vector<4x128xbf16>
    %cst_50 = arith.constant dense<0.000000e+00> : vector<256x128xf32>
    %66 = tpu.matmul %63, %65, %cst_50 {dimension_numbers = #tpu.dot_dimension_numbers<[1], [0], [0], [1], [0, 0, 1, 1], [], []>} : vector<256x4xbf16>, vector<4x128xbf16>, vector<256x128xf32> -> vector<256x128xf32>
    %67 = arith.addf %61, %66 : vector<256x128xf32>
    %c0_51 = arith.constant 0 : index
    %c0_52 = arith.constant 0 : index
    %68 = vector.load %arg4[%c0_51, %c0_52] : memref<1x128xf32, #tpu.memory_space<vmem>>, vector<1x128xf32>
    %69 = vector.broadcast %68 : vector<1x128xf32> to vector<256x128xf32>
    %70 = arith.addf %67, %69 : vector<256x128xf32>
    %71 = vector.shape_cast %70 : vector<256x128xf32> to vector<1x16x16x128xf32>
    %c0_53 = arith.constant 0 : index
    %c0_54 = arith.constant 0 : index
    %c0_55 = arith.constant 0 : index
    %c0_56 = arith.constant 0 : index
    %72 = vector.load %arg5[%c0_53, %c0_54, %c0_55, %c0_56] : memref<1x16x16x128xf32, #tpu.memory_space<vmem>>, vector<1x16x16x128xf32>
    tpu.vector_store %arg5[%c0_53, %c0_54, %c0_55, %c0_56], %71 {strides = array<i32>} : memref<1x16x16x128xf32, #tpu.memory_space<vmem>>, vector<1x16x16x128xf32>,
    return
  }
  func.func @transform_0(%arg0: i32, %arg1: i32) -> (i32, i32, i32, i32) {
    %c0_i32 = arith.constant 0 : i32
    %c0_i32_0 = arith.constant 0 : i32
    %c0_i32_1 = arith.constant 0 : i32
    %c0_i32_2 = arith.constant 0 : i32
    return %arg0, %c0_i32, %c0_i32_0, %c0_i32_1 : i32, i32, i32, i32
  }
  func.func @transform_1(%arg0: i32, %arg1: i32) -> (i32, i32, i32, i32) {
    %c0_i32 = arith.constant 0 : i32
    %c0_i32_0 = arith.constant 0 : i32
    %c0_i32_1 = arith.constant 0 : i32
    %c0_i32_2 = arith.constant 0 : i32
    %c0_i32_3 = arith.constant 0 : i32
    return %c0_i32, %c0_i32_0, %c0_i32_1, %c0_i32_2 : i32, i32, i32, i32
  }
  func.func @transform_2(%arg0: i32, %arg1: i32) -> (i32, i32) {
    %c0_i32 = arith.constant 0 : i32
    %c0_i32_0 = arith.constant 0 : i32
    %c0_i32_1 = arith.constant 0 : i32
    return %c0_i32, %c0_i32_0 : i32, i32
  }
  func.func @transform_3(%arg0: i32, %arg1: i32) -> (i32, i32, i32, i32) {
    %c0_i32 = arith.constant 0 : i32
    %c0_i32_0 = arith.constant 0 : i32
    %c0_i32_1 = arith.constant 0 : i32
    return %arg0, %arg1, %c0_i32, %c0_i32_0 : i32, i32, i32, i32
  }
}

</mosaic_0001>

<bundles_post_ra>
// kernel: tpu_custom_call.1
= control target key start
LH: loop header
LB: loop body
LE: loop exit
PB: predicated region body
PF: predicated region fallthrough
CT: control target
= control target key end

     0   :  { %8 = vsyncpa [#allocation3], 0  ;;  %s8378_s0 = inlined_call_operand.vmem [shape: bf16[2,18,18,4], index: 0, kind: input, shape index: {}]   ;;  %s8379_s1 = inlined_call_operand.vmem [shape: bf16[3,3,4,128], index: 1, kind: input, shape index: {}]   ;;  %s8380_s2 = inlined_call_operand.vmem [shape: f32[1,128], index: 2, kind: input, shape index: {}]   ;;  %s8381_s3 = inlined_call_operand.hbm [shape: f32[2,16,16,128], index: 3, kind: output, shape index: {}]  }
   0x1   :  { %10 = vsyncpa [#allocation3 + $0x1], 0  ;;  %s6235_s12 = smov 0   ;;  %s6237_s13 = smov 0  }
   0x2   :  { %s6239_s14 = smov 0   ;;  %s6241_s15 = smov 0  }
   0x3   :  { %s6243_s16 = smov 0   ;;  %s6245_s17 = smov 0  }
   0x4 LB: > { %s4733_s18 = sadd.s32 4294967295, %s6210_s17   ;;  %s4734_s19 = sadd.s32 4294967294, %s6210_s17   ;;  %s6210_s17 = sphi %s6245_s17, %s16_s17   ;;  %s6206_s16 = sphi %s6243_s16, %s8500_s16   ;;  %s6202_s15 = sphi %s6241_s15, %s8499_s15   ;;  %s6198_s14 = sphi %s6239_s14, %s8498_s14   ;;  %s6194_s13 = sphi %s6237_s13, %s8497_s13   ;;  %s6190_s12 = sphi %s6235_s12, %s8496_s12  }
   0x5   : > { %s28_s20 = sadd.s32 1, %s6206_s16  ;;  %s105_s21 = sadd.s32 1, %s6198_s14 }
   0x6   : > { %p30_p0 = scmp.ge.s32.totalorder %s28_s20, 2  ;;  %p115_p1 = scmp.ne.s32.totalorder %s6198_s14, %s6194_s13 }
   0x7   : > { %p116_p2 = scmp.eq.s32.totalorder %s4733_s18, 1  ;;  %p121_p3 = scmp.ne.s32.totalorder %s6194_s13, %s6190_s12 }
   0x8   : > { %s8502_s20 = smov (%p30_p0, %s28_s20), 0  ;;  %p122_p5 = scmp.eq.s32.totalorder %s4734_s19, 1 }
   0x9   : > { %p6275_p4 = por %p116_p2, %p115_p1  ;;  %s100_s23 = ssub.s32 %s6206_s16, %s8502_s20 }
   0xa   : > { %p4737_p6 = scmp.ge.s32.totalorder %s6210_s17, 1  ;;  %p103_p7 = scmp.eq.s32.totalorder %s100_s23, 0 }
   0xb   : > { %p6282_p8 = por %p122_p5, %p121_p3  ;;  %p154_p9 = scmp.lt.s32.totalorder %s6210_s17, 3 }
   0xc   : > { %s6288_s25 = scalar_select %p103_p7, %s6198_s14, %s105_s21  }
   0xd   : > { %p155_p10 = pnand %p4737_p6, %p154_p9 }
   0xf   : > { %158 = sbr.rel (%p155_p10) target bundleno = 613 (0x265), region = 32 }
  0x16   : > { %v4740_v0 = vld [vmem:[%s8379_s1 + $0x2] sm:$0x3]  ;;  %vm724_vm0 = vcmask 1041408   ;;  %v4935_v1 = vld [vmem:[%s8379_s1 + $0x8] sm:$0x3]  ;;  %p178_p11 = scmp.lt.s32.totalorder %s6202_s15, 1 }
  0x17   : > { %5904 = vmatprep.subr.msk.bf16.mxu1 %vm724_vm0, %v4740_v0  ;;  %5908 = vmatprep.subr.msk.bf16.mxu0 %vm724_vm0, %v4935_v1  ;;  %v726_v2 = vsel %vm724_vm0, %v4740_v0, 0  ;;  %v6301_v3 = vsel %vm724_vm0, %v4935_v1, 0  ;;  %v237_v4 = vld [vmem:[%s8379_s1] sm:$0x3]  ;;  %v4984_v5 = vld [vmem:[%s8379_s1 + $0xa] sm:$0x3] }
  0x18   : > { %8406 = vst [vmem:[#allocation5_spill] sm:$0xff] %v6301_v3  ;;  %5341 = vmatpush3.bf16.msra.mxu1 %v726_v2  ;;  %5477 = vmatpush3.bf16.msra.mxu0 %v6301_v3  ;;  %s179_s30 = scalar_select %p178_p11, %s6202_s15, 1  ;;  %vm238_vm1 = vsmask.f32 3328  ;;  %vm239_vm2 = vsmask.f32 7440 }
  0x19   : > { %5905 = vmatprep.subr.msk.bf16.mxu1 %vm724_vm0, %v237_v4  ;;  %5910 = vmatprep.subr.msk.bf16.mxu0 %vm724_vm0, %v4984_v5  ;;  %vm675_vm3 = vcmask 31744   ;;  %v6331_v17 = vsel %vm724_vm0, %v237_v4, 0  ;;  %vm6342_vm4 = vmor %vm238_vm1, %vm239_vm2  ;;  %v6347_v36 = vsel %vm724_vm0, %v4984_v5, 0  ;;  %v6357_v50 = vld [vmem:[%s8379_s1 + $0xc] sm:$0x3]  ;;  %vm1197_vm5 = vcmask 1042432  }
  0x1a   : > { %s5914_s8 = smul.u32 216, %s179_s30  ;;  %v6374_v1 = vsel %vm724_vm0, %v6357_v50, 0  ;;  %vm1198_vm6 = vcmask 1046532   ;;  %s175_s9 = sand.u32 1, %s6194_s13  }
  0x1b   : > { %vm6608_vm7 = vmor %vm1197_vm5, %vm1198_vm6  ;;  %s4738_s10 = sshll.u32 %s175_s9, 8  ;;  %s5186_s21 = sshll.u32 %s6202_s15, 12 }
  0x1c   : > { %s6316_s11 = scalar_lea.vmem %s8378_s0, %s5914_s8  ;;  %s8257_s19 = scalar_lea.vmem [#allocation2], %s4738_s10 }
  0x1d   : > { %v189_v6 = vld [vmem:[%s6316_s11] sm:$0xf]  ;;  %v190_v7 = vld [vmem:[%s6316_s11 + $0x4] sm:$0xf]  ;;  %v191_v8 = vld [vmem:[%s6316_s11 + $0x8] sm:$0x1]  ;;  %s8322_s28 = scalar_lea.hbm %s8381_s3, %s5186_s21 }
  0x1e   : > { %v242_v9 = vshrl.u32 %v189_v6, 16  ;;  %v245_v10 = vshll.u32 %v189_v6, 16  ;;  %v251_v11 = vshll.u32 %v190_v7, 16  ;;  %v255_v12 = vshrl.u32 %v190_v7, 16  ;;  %v6322_v13 = vld [vmem:[%s6316_s11 + $0xc] sm:$0xf] }
  0x1f   : > { %v261_v14 = vshll.u32 %v191_v8, 16  ;;  %v6325_v15 = vld [vmem:[%s6316_s11 + $0x10] sm:$0xf]  ;;  %v6328_v16 = vld [vmem:[%s6316_s11 + $0x14] sm:$0x1]  ;;  %v1985_v23 = vshrl.u32 %v6322_v13, 16 }
  0x20   : > { %v244_v18 = vrot.slane %v242_v9, 4  ;;  %v247_v19 = vrot.slane %v245_v10, 5  ;;  %v253_v20 = vrot.slane %v251_v11, 5  ;;  %v257_v21 = vrot.slane %v255_v12, 4  ;;  %v192_v30 = vld [vmem:[%s6316_s11 + $0xc] sm:$0xf] }
  0x21   : > { %v263_v22 = vrot.slane %v261_v14, 5  ;;  %v1988_v24 = vshll.u32 %v6322_v13, 16  ;;  %v1994_v25 = vshll.u32 %v6325_v15, 16  ;;  %v1998_v28 = vshrl.u32 %v6325_v15, 16  ;;  %v193_v31 = vld [vmem:[%s6316_s11 + $0x10] sm:$0xf] }
  0x22   : > { %v248_v26 = vor.u32 %v247_v19, %v244_v18  ;;  %v258_v27 = vor.u32 %v257_v21, %v253_v20  ;;  %v2004_v29 = vshll.u32 %v6328_v16, 16  ;;  %v1987_v33 = vrot.slane %v1985_v23, 4  ;;  %v194_v42 = vld [vmem:[%s6316_s11 + $0x14] sm:$0x1]  ;;  %v6360_v55 = vld [vmem:[%s6316_s11 + $0x18] sm:$0xf] }
  0x23   : > { %v1990_v34 = vrot.slane %v1988_v24, 5  ;;  %v1996_v35 = vrot.slane %v1994_v25, 5  ;;  %v2000_v39 = vrot.slane %v1998_v28, 4  ;;  %v266_v43 = vshrl.u32 %v192_v30, 16  ;;  %v6363_v60 = vld [vmem:[%s6316_s11 + $0x1c] sm:$0xf] }
  0x24   : > { %v249_v37 = vrot.slane %v248_v26, 4  ;;  %v259_v38 = vrot.slane %v258_v27, 4  ;;  %v2006_v40 = vrot.slane %v2004_v29, 5  ;;  %v269_v44 = vshll.u32 %v192_v30, 16  ;;  %v6370_v0 = vld [vmem:[%s6316_s11 + $0x20] sm:$0x1] }
  0x25   : > { %v1991_v41 = vor.u32 %v1990_v34, %v1987_v33  ;;  %v275_v45 = vshll.u32 %v193_v31, 16  ;;  %v2001_v48 = vor.u32 %v2000_v39, %v1996_v35  ;;  %v279_v49 = vshrl.u32 %v193_v31, 16  ;;  %v195_v11 = vld [vmem:[%s6316_s11 + $0x18] sm:$0xf]  ;;  %v197_v25 = vld [vmem:[%s6316_s11 + $0x20] sm:$0x1] }
  0x26   : > { %v254_v46 = vsel %vm6342_vm4, %v249_v37, %v253_v20  ;;  %v264_v47 = vsel %vm6342_vm4, %v259_v38, %v263_v22  ;;  %v268_v53 = vrot.slane %v266_v43, 4  ;;  %v271_v54 = vrot.slane %v269_v44, 5  ;;  %v196_v20 = vld [vmem:[%s6316_s11 + $0x1c] sm:$0xf]  ;;  %v6394_v30 = vld [vmem:[%s6316_s11 + $0x24] sm:$0xf] }
  0x27   : > { %v4741_v51 = vcombine.low %v254_v46, %v264_v47  ;;  %v1992_v52 = vrot.slane %v1991_v41, 4  ;;  %v2002_v56 = vrot.slane %v2001_v48, 4  ;;  %v277_v57 = vrot.slane %v275_v45, 5  ;;  %v4821_v41 = vld [vmem:[%s8379_s1 + $0x4] sm:$0x3]  ;;  %s4650_s23 = sshll.u32 %s8257_s19, 4  ;;  %s8324_s23 = int_to_ptr.vmem [resolvable:$true] %s4650_s23 }
  0x28   : > { %v281_v58 = vrot.slane %v279_v49, 4  ;;  %v285_v59 = vshll.u32 %v194_v42, 16  ;;  %v2683_v62 = vrot.slane %v6328_v16, 5  ;;  %v272_v63 = vor.u32 %v271_v54, %v268_v53  ;;  %v6401_v45 = vld [vmem:[%s6316_s11 + $0x28] sm:$0xf]  ;;  %s8332_s15 = scalar_lea.sflag [#allocation3], %s175_s9 }
  0x29   : > { %5342 = vmatprep.mubr.msk.bf16.mxu1 %vm675_vm3, %v4741_v51  ;;  %v1997_v61 = vsel %vm6342_vm4, %v1992_v52, %v1996_v35  ;;  %v2007_v2 = vsel %vm6342_vm4, %v2002_v56, %v2006_v40  ;;  %v2009_v6 = vshrl.u32 %v6360_v55, 16  ;;  %v2012_v9 = vshll.u32 %v6360_v55, 16  ;;  %v6406_v52 = vld [vmem:[%s6316_s11 + $0x2c] sm:$0x1]  ;;  %v7190_v3 = vld [vmem:[%s6316_s11 + $0xb8] sm:$0xf] }
  0x2a   : > { %v282_v4 = vor.u32 %v281_v58, %v277_v57  ;;  %v287_v5 = vrot.slane %v285_v59, 5  ;;  %v4936_v7 = vcombine.low %v1997_v61, %v2007_v2  ;;  %v273_v8 = vrot.slane %v272_v63, 4  ;;  %v198_v58 = vld [vmem:[%s6316_s11 + $0x24] sm:$0xf]  ;;  %s6132_s29 = scalar_lea.vmem %s8324_s23, 4096  ;;  %s6212_s30 = smov [#allocation2]  }
  0x2b   : > { %v2018_v10 = vshll.u32 %v6363_v60, 16  ;;  %v2011_v14 = vrot.slane %v2009_v6, 4  ;;  %v2022_v18 = vshrl.u32 %v6363_v60, 16  ;;  %v2028_v19 = vshll.u32 %v6370_v0, 16  ;;  %p6133_p12 = scmp.ne.s32.totalorder %s8324_s23, %s6132_s29  ;;  %s6136_s4 = sshll.u32 %s6212_s30, 4  ;;  %s6137_s4 = int_to_ptr.vmem [resolvable:$false] %s6136_s4 }
  0x2c   : > { %v283_v12 = vrot.slane %v282_v4, 4  ;;  %5478 = vmatprep.mubr.msk.bf16.mxu0 %vm675_vm3, %v4936_v7  ;;  %v278_v21 = vsel %vm6342_vm4, %v273_v8, %v277_v57  ;;  %v2014_v22 = vrot.slane %v2012_v9, 5  ;;  %v2687_v24 = vrot.slane %v6363_v60, 5  ;;  %v199_v7 = vld [vmem:[%s6316_s11 + $0x28] sm:$0xf]  ;;  %s6138_s5 = scalar_lea.vmem %s6137_s4, 8192  ;;  %p6139_p1 = scmp.lt.s32.totalorder %s8324_s23, %s6137_s4 }
  0x2d   : > { %v2020_v23 = vrot.slane %v2018_v10, 5  ;;  %v2024_v27 = vrot.slane %v2022_v18, 4  ;;  %v2030_v28 = vrot.slane %v2028_v19, 5  ;;  %v2690_v29 = vrot.slane %v6370_v0, 5  ;;  %v200_v19 = vld [vmem:[%s6316_s11 + $0x2c] sm:$0x1]  ;;  %p6134_p13 = pnand %p6133_p12, %p6275_p4  ;;  %p6140_p2 = scmp.lt.s32.totalorder %s6138_s5, %s6132_s29 }
  0x2e   : > { %v288_v26 = vsel %vm6342_vm4, %v283_v12, %v287_v5  ;;  %v2015_v33 = vor.u32 %v2014_v22, %v2011_v14  ;;  %v290_v34 = vshrl.u32 %v195_v11, 16  ;;  %v293_v35 = vshll.u32 %v195_v11, 16 }
  0x2f   : > { %v4742_v31 = vcombine.low %v278_v21, %v288_v26  ;;  %v2025_v37 = vor.u32 %v2024_v27, %v2020_v23  ;;  %v299_v38 = vshll.u32 %v196_v20, 16  ;;  %v303_v39 = vshrl.u32 %v196_v20, 16  ;;  %v6424_v21 = vld [vmem:[%s6316_s11 + $0x30] sm:$0xf]  ;;  %p6135_p0 = pneg %p6134_p13  ;;  %p6141_p3 = por %p6140_p2, %p6139_p1 }
  0x30   : > { %v309_v40 = vshll.u32 %v197_v25, 16  ;;  %v2016_v42 = vrot.slane %v2015_v33, 4  ;;  %v292_v43 = vrot.slane %v290_v34, 4  ;;  %v295_v44 = vrot.slane %v293_v35, 5  ;;  %v6430_v34 = vld [vmem:[%s6316_s11 + $0x34] sm:$0xf] }
  0x31   : > { %5343 = vmatmul.mubr.msk.bf16.vlgmr.msra.gmra.mrb[0].mxu1 %vm675_vm3, %v4742_v31  ;;  %v2033_v46 = vshrl.u32 %v6394_v30, 16  ;;  %v2026_v47 = vrot.slane %v2025_v37, 4  ;;  %v301_v48 = vrot.slane %v299_v38, 5  ;;  %v305_v49 = vrot.slane %v303_v39, 4  ;;  %p6142_p5 = pnand %p6141_p3, %p6135_p0 }
  0x32   : > { %5375 = vmatpush3.bf16.msra.mxu1 %v6331_v17  ;;  %v311_v51 = vrot.slane %v309_v40, 5  ;;  %v2021_v53 = vsel %vm6342_vm4, %v2016_v42, %v2020_v23  ;;  %v296_v54 = vor.u32 %v295_v44, %v292_v43  ;;  %v2036_v57 = vshll.u32 %v6394_v30, 16  ;;  %v6439_v42 = vld [vmem:[%s6316_s11 + $0x38] sm:$0x1]  ;;  %v6443_v44 = vld [vmem:[%s6316_s11 + $0x30] sm:$0xf] }
  0x33   : > { %v2035_v56 = vrot.slane %v2033_v46, 4  ;;  %5906 = vmatprep.subr.msk.bf16.mxu1 %vm724_vm0, %v4821_v41  ;;  %v2031_v17 = vsel %vm6342_vm4, %v2026_v47, %v2030_v28  ;;  %v306_v59 = vor.u32 %v305_v49, %v301_v48  ;;  %v2042_v61 = vshll.u32 %v6401_v45, 16 }
  0x34   : > { %v2046_v63 = vshrl.u32 %v6401_v45, 16  ;;  %v4937_v2 = vcombine.low %v2021_v53, %v2031_v17  ;;  %v297_v4 = vrot.slane %v296_v54, 4  ;;  %v2038_v5 = vrot.slane %v2036_v57, 5 }
  0x35   : > { %v2052_v6 = vshll.u32 %v6406_v52, 16  ;;  %v307_v8 = vrot.slane %v306_v59, 4  ;;  %v2044_v9 = vrot.slane %v2042_v61, 5  ;;  %v314_v11 = vshrl.u32 %v198_v58, 16 }
  0x36   : > { %v2048_v10 = vrot.slane %v2046_v63, 4  ;;  %5479 = vmatmul.mubr.msk.bf16.vlgmr.msra.gmra.mrb[0].mxu0 %vm675_vm3, %v4937_v2  ;;  %v302_v12 = vsel %vm6342_vm4, %v297_v4, %v301_v48  ;;  %v2039_v14 = vor.u32 %v2038_v5, %v2035_v56  ;;  %v317_v20 = vshll.u32 %v198_v58, 16  ;;  %v6449_v56 = vld [vmem:[%s6316_s11 + $0x34] sm:$0xf]  ;;  %v203_v4 = vld [vmem:[%s6316_s11 + $0x38] sm:$0x1] }
  0x37   : > { %v2054_v18 = vrot.slane %v2052_v6, 5  ;;  %5511 = vmatpush3.bf16.msra.mxu0 %v6347_v36  ;;  %v312_v22 = vsel %vm6342_vm4, %v307_v8, %v311_v51  ;;  %v316_v25 = vrot.slane %v314_v11, 4  ;;  %v323_v26 = vshll.u32 %v199_v7, 16 }
  0x38   : > { %v2049_v23 = vor.u32 %v2048_v10, %v2044_v9  ;;  %v4743_v27 = vcombine.low %v302_v12, %v312_v22  ;;  %v2040_v28 = vrot.slane %v2039_v14, 4  ;;  %v319_v31 = vrot.slane %v317_v20, 5  ;;  %5911 = vmatprep.subr.msk.bf16.mxu0 %vm724_vm0, %v6357_v50  ;;  %v6461_v10 = vld [vmem:[%s6316_s11 + $0x3c] sm:$0xf] }
  0x39   : > { %v327_v33 = vshrl.u32 %v199_v7, 16  ;;  %v325_v37 = vrot.slane %v323_v26, 5  ;;  %v333_v36 = vshll.u32 %v200_v19, 16  ;;  %v2057_v38 = vshrl.u32 %v6424_v21, 16  ;;  %v6467_v19 = vld [vmem:[%s6316_s11 + $0x40] sm:$0xf] }
  0x3a   : > { %v2050_v35 = vrot.slane %v2049_v23, 4  ;;  %5346 = vmatprep.mubr.msk.bf16.mxu1 %vm675_vm3, %v4743_v27  ;;  %v2045_v39 = vsel %vm6342_vm4, %v2040_v28, %v2044_v9  ;;  %v320_v40 = vor.u32 %v319_v31, %v316_v25  ;;  %v2060_v43 = vshll.u32 %v6424_v21, 16  ;;  %v6472_v31 = vld [vmem:[%s6316_s11 + $0x44] sm:$0x1] }
  0x3b   : > { %v329_v41 = vrot.slane %v327_v33, 4  ;;  %v335_v46 = vrot.slane %v333_v36, 5  ;;  %v2059_v47 = vrot.slane %v2057_v38, 4  ;;  %v2066_v48 = vshll.u32 %v6430_v34, 16 }
  0x3c   : > { %v2055_v50 = vsel %vm6342_vm4, %v2050_v35, %v2054_v18  ;;  %v321_v51 = vrot.slane %v320_v40, 4  ;;  %v2062_v54 = vrot.slane %v2060_v43, 5  ;;  %v2070_v58 = vshrl.u32 %v6430_v34, 16 }
  0x3d   : > { %v4938_v49 = vcombine.low %v2045_v39, %v2055_v50  ;;  %v330_v53 = vor.u32 %v329_v41, %v325_v37  ;;  %v2068_v57 = vrot.slane %v2066_v48, 5  ;;  %v2076_v17 = vshll.u32 %v6439_v42, 16  ;;  %v6480_v50 = vld [vmem:[%s6316_s11 + $0x3c] sm:$0xf] }
  0x3e   : > { %v338_v59 = vshrl.u32 %v6443_v44, 16  ;;  %v326_v61 = vsel %vm6342_vm4, %v321_v51, %v325_v37  ;;  %v2063_v2 = vor.u32 %v2062_v54, %v2059_v47  ;;  %v341_v5 = vshll.u32 %v6443_v44, 16  ;;  %v6486_v51 = vld [vmem:[%s6316_s11 + $0x40] sm:$0xf] }
  0x3f   : > { %5482 = vmatprep.mubr.msk.bf16.mxu0 %vm675_vm3, %v4938_v49  ;;  %v331_v63 = vrot.slane %v330_v53, 4  ;;  %v2072_v6 = vrot.slane %v2070_v58, 4  ;;  %v2078_v7 = vrot.slane %v2076_v17, 5  ;;  %v347_v9 = vshll.u32 %v6449_v56, 16 }
  0x40   : > { %v340_v8 = vrot.slane %v338_v59, 4  ;;  %v2064_v12 = vrot.slane %v2063_v2, 4  ;;  %v343_v14 = vrot.slane %v341_v5, 5  ;;  %v351_v18 = vshrl.u32 %v6449_v56, 16 }
  0x41   : > { %v336_v11 = vsel %vm6342_vm4, %v331_v63, %v335_v46  ;;  %v2073_v22 = vor.u32 %v2072_v6, %v2068_v57  ;;  %v349_v23 = vrot.slane %v347_v9, 5  ;;  %v357_v25 = vshll.u32 %v203_v4, 16 }
  0x42   : > { %v4744_v20 = vcombine.low %v326_v61, %v336_v11  ;;  %v2069_v26 = vsel %vm6342_vm4, %v2064_v12, %v2068_v57  ;;  %v344_v27 = vor.u32 %v343_v14, %v340_v8  ;;  %v353_v28 = vrot.slane %v351_v18, 4  ;;  %v206_v61 = vld [vmem:[%s6316_s11 + $0x44] sm:$0x1]  ;;  %v6499_v8 = vld [vmem:[%s6316_s11 + $0x48] sm:$0xf] }
  0x43   : > { %v2081_v33 = vshrl.u32 %v6461_v10, 16  ;;  %v2074_v35 = vrot.slane %v2073_v22, 4  ;;  %v359_v37 = vrot.slane %v357_v25, 5  ;;  %v2084_v36 = vshll.u32 %v6461_v10, 16  ;;  %v6502_v18 = vld [vmem:[%s6316_s11 + $0x4c] sm:$0xf] }
  0x44   : > { %5347 = vmatmul.mubr.msk.bf16.gmra.mrb[4].mxu1 %vm675_vm3, %v4744_v20  ;;  %v2090_v38 = vshll.u32 %v6467_v19, 16  ;;  %v345_v39 = vrot.slane %v344_v27, 4  ;;  %v354_v40 = vor.u32 %v353_v28, %v349_v23  ;;  %v2094_v43 = vshrl.u32 %v6467_v19, 16  ;;  %v6508_v28 = vld [vmem:[%s6316_s11 + $0x50] sm:$0x1] }
  0x45   : > { %v2083_v41 = vrot.slane %v2081_v33, 4  ;;  %v2079_v46 = vsel %vm6342_vm4, %v2074_v35, %v2078_v7  ;;  %v2086_v47 = vrot.slane %v2084_v36, 5  ;;  %v2100_v49 = vshll.u32 %v6472_v31, 16 }
  0x46   : > { %v2092_v48 = vrot.slane %v2090_v38, 5  ;;  %v4939_v53 = vcombine.low %v2069_v26, %v2079_v46  ;;  %v350_v54 = vsel %vm6342_vm4, %v345_v39, %v349_v23  ;;  %v355_v57 = vrot.slane %v354_v40, 4  ;;  %v6516_v40 = vld [vmem:[%s6316_s11 + $0x48] sm:$0xf] }
  0x47   : > { %v2096_v58 = vrot.slane %v2094_v43, 4  ;;  %v2087_v17 = vor.u32 %v2086_v47, %v2083_v41  ;;  %v2102_v59 = vrot.slane %v2100_v49, 5  ;;  %v362_v63 = vshrl.u32 %v6480_v50, 16 }
  0x48   : > { %v365_v2 = vshll.u32 %v6480_v50, 16  ;;  %5483 = vmatmul.mubr.msk.bf16.gmra.mrb[4].mxu0 %vm675_vm3, %v4939_v53  ;;  %v360_v4 = vsel %vm6342_vm4, %v355_v57, %v359_v37  ;;  %v371_v6 = vshll.u32 %v6486_v51, 16  ;;  %v375_v7 = vshrl.u32 %v6486_v51, 16 }
  0x49   : > { %v2097_v5 = vor.u32 %v2096_v58, %v2092_v48  ;;  %v4745_v9 = vcombine.low %v350_v54, %v360_v4  ;;  %v2088_v11 = vrot.slane %v2087_v17, 4  ;;  %v364_v12 = vrot.slane %v362_v63, 4 }
  0x4a   : > { %v367_v14 = vrot.slane %v365_v2, 5  ;;  %v373_v22 = vrot.slane %v371_v6, 5  ;;  %v377_v23 = vrot.slane %v375_v7, 4  ;;  %v381_v25 = vshll.u32 %v206_v61, 16  ;;  %v6533_v7 = vld [vmem:[%s6316_s11 + $0x54] sm:$0xf] }
  0x4b   : > { %v2098_v20 = vrot.slane %v2097_v5, 4  ;;  %5350 = vmatprep.mubr.msk.bf16.mxu1 %vm675_vm3, %v4745_v9  ;;  %v2093_v26 = vsel %vm6342_vm4, %v2088_v11, %v2092_v48  ;;  %v2105_v33 = vshrl.u32 %v6499_v8, 16  ;;  %v2108_v35 = vshll.u32 %v6499_v8, 16  ;;  %v6519_v48 = vld [vmem:[%s6316_s11 + $0x4c] sm:$0xf] }
  0x4c   : > { %v368_v27 = vor.u32 %v367_v14, %v364_v12  ;;  %v378_v36 = vor.u32 %v377_v23, %v373_v22  ;;  %v383_v38 = vrot.slane %v381_v25, 5  ;;  %v2114_v39 = vshll.u32 %v6502_v18, 16 }
  0x4d   : > { %v2103_v37 = vsel %vm6342_vm4, %v2098_v20, %v2102_v59  ;;  %v2107_v46 = vrot.slane %v2105_v33, 4  ;;  %v2110_v47 = vrot.slane %v2108_v35, 5  ;;  %v2118_v54 = vshrl.u32 %v6502_v18, 16  ;;  %v209_v59 = vld [vmem:[%s6316_s11 + $0x50] sm:$0x1] }
  0x4e   : > { %v4940_v41 = vcombine.low %v2093_v26, %v2103_v37  ;;  %v369_v43 = vrot.slane %v368_v27, 4  ;;  %v379_v49 = vrot.slane %v378_v36, 4  ;;  %v2116_v53 = vrot.slane %v2114_v39, 5  ;;  %v6536_v20 = vld [vmem:[%s6316_s11 + $0x58] sm:$0xf] }
  0x4f   : > { %v2124_v57 = vshll.u32 %v6508_v28, 16  ;;  %v2111_v17 = vor.u32 %v2110_v47, %v2107_v46  ;;  %v386_v61 = vshrl.u32 %v6516_v40, 16  ;;  %v389_v63 = vshll.u32 %v6516_v40, 16  ;;  %v6543_v35 = vld [vmem:[%s6316_s11 + $0x5c] sm:$0x1] }
  0x50   : > { %5486 = vmatprep.mubr.msk.bf16.mxu0 %vm675_vm3, %v4940_v41  ;;  %v374_v58 = vsel %vm6342_vm4, %v369_v43, %v373_v22  ;;  %v384_v2 = vsel %vm6342_vm4, %v379_v49, %v383_v38  ;;  %v2120_v4 = vrot.slane %v2118_v54, 4  ;;  %v395_v6 = vshll.u32 %v6519_v48, 16 }
  0x51   : > { %v2126_v5 = vrot.slane %v2124_v57, 5  ;;  %v4746_v9 = vcombine.low %v374_v58, %v384_v2  ;;  %v2112_v11 = vrot.slane %v2111_v17, 4  ;;  %v388_v12 = vrot.slane %v386_v61, 4  ;;  %v6556_v61 = vld [vmem:[%s6316_s11 + $0x58] sm:$0xf] }
  0x52   : > { %v391_v14 = vrot.slane %v389_v63, 5  ;;  %v2121_v22 = vor.u32 %v2120_v4, %v2116_v53  ;;  %v397_v23 = vrot.slane %v395_v6, 5  ;;  %v399_v25 = vshrl.u32 %v6519_v48, 16 }
  0x53   : > { %v405_v26 = vshll.u32 %v209_v59, 16  ;;  %5351 = vmatmul.mubr.msk.bf16.gmra.mrb[8].mxu1 %vm675_vm3, %v4746_v9  ;;  %v2117_v27 = vsel %vm6342_vm4, %v2112_v11, %v2116_v53  ;;  %v2129_v37 = vshrl.u32 %v6533_v7, 16  ;;  %v2132_v36 = vshll.u32 %v6533_v7, 16  ;;  %v6550_v53 = vld [vmem:[%s6316_s11 + $0x54] sm:$0xf] }
  0x54   : > { %v392_v33 = vor.u32 %v391_v14, %v388_v12  ;;  %v2122_v38 = vrot.slane %v2121_v22, 4  ;;  %v401_v39 = vrot.slane %v399_v25, 4  ;;  %v2138_v43 = vshll.u32 %v6536_v20, 16  ;;  %v212_v9 = vld [vmem:[%s6316_s11 + $0x5c] sm:$0x1] }
  0x55   : > { %v407_v41 = vrot.slane %v405_v26, 5  ;;  %v2131_v47 = vrot.slane %v2129_v37, 4  ;;  %v2134_v49 = vrot.slane %v2132_v36, 5  ;;  %v2142_v54 = vshrl.u32 %v6536_v20, 16 }
  0x56   : > { %v393_v46 = vrot.slane %v392_v33, 4  ;;  %v2127_v57 = vsel %vm6342_vm4, %v2122_v38, %v2126_v5  ;;  %v402_v58 = vor.u32 %v401_v39, %v397_v23  ;;  %v2140_v17 = vrot.slane %v2138_v43, 5  ;;  %v6572_v39 = vld [vmem:[%s6316_s11 + $0x64] sm:$0xf] }
  0x57   : > { %v2148_v59 = vshll.u32 %v6543_v35, 16  ;;  %v4941_v63 = vcombine.low %v2117_v27, %v2127_v57  ;;  %v2135_v4 = vor.u32 %v2134_v49, %v2131_v47  ;;  %v2144_v6 = vrot.slane %v2142_v54, 4 }
  0x58   : > { %v398_v2 = vsel %vm6342_vm4, %v393_v46, %v397_v23  ;;  %v403_v11 = vrot.slane %v402_v58, 4  ;;  %v410_v14 = vshrl.u32 %v6550_v53, 16  ;;  %v413_v5 = vshll.u32 %v6550_v53, 16  ;;  %v6567_v23 = vld [vmem:[%s6316_s11 + $0x60] sm:$0xf] }
  0x59   : > { %v2150_v12 = vrot.slane %v2148_v59, 5  ;;  %5487 = vmatmul.mubr.msk.bf16.gmra.mrb[8].mxu0 %vm675_vm3, %v4941_v63  ;;  %v2136_v22 = vrot.slane %v2135_v4, 4  ;;  %v2145_v25 = vor.u32 %v2144_v6, %v2140_v17  ;;  %v419_v26 = vshll.u32 %v6556_v61, 16  ;;  %v6577_v59 = vld [vmem:[%s6316_s11 + $0x68] sm:$0x1] }
  0x5a   : > { %v423_v27 = vshrl.u32 %v6556_v61, 16  ;;  %v408_v33 = vsel %vm6342_vm4, %v403_v11, %v407_v41  ;;  %v412_v37 = vrot.slane %v410_v14, 4  ;;  %v415_v36 = vrot.slane %v413_v5, 5  ;;  %v6587_v6 = vld [vmem:[%s6316_s11 + $0x60] sm:$0xf] }
  0x5b   : > { %v429_v38 = vshll.u32 %v212_v9, 16  ;;  %v4747_v43 = vcombine.low %v398_v2, %v408_v33  ;;  %v2141_v46 = vsel %vm6342_vm4, %v2136_v22, %v2140_v17  ;;  %v2146_v47 = vrot.slane %v2145_v25, 4  ;;  %v6590_v22 = vld [vmem:[%s6316_s11 + $0x64] sm:$0xf] }
  0x5c   : > { %v421_v49 = vrot.slane %v419_v26, 5  ;;  %v416_v54 = vor.u32 %v415_v36, %v412_v37  ;;  %v425_v57 = vrot.slane %v423_v27, 4  ;;  %v2153_v41 = vshrl.u32 %v6567_v23, 16 }
  0x5d   : > { %v431_v58 = vrot.slane %v429_v38, 5  ;;  %5354 = vmatprep.mubr.msk.bf16.mxu1 %vm675_vm3, %v4747_v43  ;;  %v2151_v63 = vsel %vm6342_vm4, %v2146_v47, %v2150_v12  ;;  %v2156_v2 = vshll.u32 %v6567_v23, 16  ;;  %v2162_v4 = vshll.u32 %v6572_v39, 16 }
  0x5e   : > { %v2166_v17 = vshrl.u32 %v6572_v39, 16  ;;  %v4942_v9 = vcombine.low %v2141_v46, %v2151_v63  ;;  %v417_v11 = vrot.slane %v416_v54, 4  ;;  %v426_v14 = vor.u32 %v425_v57, %v421_v49  ;;  %v215_v54 = vld [vmem:[%s6316_s11 + $0x68] sm:$0x1] }
  0x5f   : > { %v2155_v5 = vrot.slane %v2153_v41, 4  ;;  %v2158_v25 = vrot.slane %v2156_v2, 5  ;;  %v2164_v26 = vrot.slane %v2162_v4, 5  ;;  %v2172_v12 = vshll.u32 %v6577_v59, 16 }
  0x60   : > { %v2168_v27 = vrot.slane %v2166_v17, 4  ;;  %5490 = vmatprep.mubr.msk.bf16.mxu0 %vm675_vm3, %v4942_v9  ;;  %v422_v33 = vsel %vm6342_vm4, %v417_v11, %v421_v49  ;;  %v427_v37 = vrot.slane %v426_v14, 4  ;;  %v434_v36 = vshrl.u32 %v6587_v6, 16  ;;  %v6604_v49 = vld [vmem:[%s6316_s11 + $0x6c] sm:$0xf] }
  0x61   : > { %v437_v38 = vshll.u32 %v6587_v6, 16  ;;  %v2159_v43 = vor.u32 %v2158_v25, %v2155_v5  ;;  %v2174_v47 = vrot.slane %v2172_v12, 5  ;;  %v443_v57 = vshll.u32 %v6590_v22, 16 }
  0x62   : > { %v2169_v46 = vor.u32 %v2168_v27, %v2164_v26  ;;  %v432_v41 = vsel %vm6342_vm4, %v427_v37, %v431_v58  ;;  %v436_v63 = vrot.slane %v434_v36, 4  ;;  %v447_v4 = vshrl.u32 %v6590_v22, 16 }
  0x63   : > { %v439_v2 = vrot.slane %v437_v38, 5  ;;  %v4748_v17 = vcombine.low %v422_v33, %v432_v41  ;;  %v2160_v9 = vrot.slane %v2159_v43, 4  ;;  %v445_v14 = vrot.slane %v443_v57, 5  ;;  %v6620_v38 = vld [vmem:[%s6316_s11 + $0x70] sm:$0xf] }
  0x64   : > { %v2170_v11 = vrot.slane %v2169_v46, 4  ;;  %v449_v25 = vrot.slane %v447_v4, 4  ;;  %v453_v27 = vshll.u32 %v215_v54, 16  ;;  %v4968_v58 = vrot.slane %v6322_v13, 9  ;;  %v218_v13 = vld [vmem:[%s6316_s11 + $0x74] sm:$0x1] }
  0x65   : > { %v440_v5 = vor.u32 %v439_v2, %v436_v63  ;;  %5355 = vmatmul.mubr.msk.bf16.gmra.mrb[12].mxu1 %vm675_vm3, %v4748_v17  ;;  %v2165_v33 = vsel %vm6342_vm4, %v2160_v9, %v2164_v26  ;;  %v2680_v36 = vrot.slane %v6325_v15, 5  ;;  %v458_v43 = vshrl.u32 %v6604_v49, 16 }
  0x66   : > { %v2175_v37 = vsel %vm6342_vm4, %v2170_v11, %v2174_v47  ;;  %v450_v57 = vor.u32 %v449_v25, %v445_v14  ;;  %v455_v41 = vrot.slane %v453_v27, 5  ;;  %v461_v47 = vshll.u32 %v6604_v49, 16 }
  0x67   : > { %v4943_v46 = vcombine.low %v2165_v33, %v2175_v37  ;;  %v441_v54 = vrot.slane %v440_v5, 4  ;;  %v2681_v63 = vsel %vm6608_vm7, %v4968_v58, %v2680_v36  ;;  %v2682_v2 = vrot.slane %v2680_v36, 4  ;;  %v6638_v58 = vld [vmem:[%s6316_s11 + $0x78] sm:$0xf] }
  0x68   : > { %v460_v26 = vrot.slane %v458_v43, 4  ;;  %v451_v4 = vrot.slane %v450_v57, 4  ;;  %v467_v17 = vshll.u32 %v6620_v38, 16  ;;  %v471_v9 = vshrl.u32 %v6620_v38, 16  ;;  %v6643_v43 = vld [vmem:[%s6316_s11 + $0x7c] sm:$0xf] }
  0x69   : > { %5491 = vmatmul.mubr.msk.bf16.gmra.mrb[12].mxu0 %vm675_vm3, %v4943_v46  ;;  %v446_v15 = vsel %vm6342_vm4, %v441_v54, %v445_v14  ;;  %v2684_v11 = vsel %vm6608_vm7, %v2682_v2, %v2683_v62  ;;  %v463_v5 = vrot.slane %v461_v47, 5  ;;  %v477_v25 = vshll.u32 %v218_v13, 16  ;;  %v221_v46 = vld [vmem:[%s6316_s11 + $0x80] sm:$0x1] }
  0x6a   : > { %v4969_v27 = vrot.slane %v6360_v55, 9  ;;  %v456_v33 = vsel %vm6342_vm4, %v451_v4, %v455_v41  ;;  %v4985_v14 = vcombine.low %v2681_v63, %v2684_v11  ;;  %v469_v37 = vrot.slane %v467_v17, 5 }
  0x6b   : > { %v473_v36 = vrot.slane %v471_v9, 4  ;;  %v4749_v54 = vcombine.low %v446_v15, %v456_v33  ;;  %v464_v16 = vor.u32 %v463_v5, %v460_v26  ;;  %v479_v57 = vrot.slane %v477_v25, 5  ;;  %v6668_v33 = vld [vmem:[%s6316_s11 + $0x88] sm:$0xf] }
  0x6c   : > { %v2688_v62 = vsel %vm6608_vm7, %v4969_v27, %v2687_v24  ;;  %5512 = vmatprep.mubr.msk.bf16.mxu0 %vm675_vm3, %v4985_v14  ;;  %v2689_v41 = vrot.slane %v2687_v24, 4  ;;  %v482_v13 = vshrl.u32 %v6638_v58, 16  ;;  %v485_v63 = vshll.u32 %v6638_v58, 16  ;;  %v6665_v27 = vld [vmem:[%s6316_s11 + $0x84] sm:$0xf] }
  0x6d   : > { %v474_v55 = vor.u32 %v473_v36, %v469_v37  ;;  %5358 = vmatprep.mubr.msk.bf16.mxu1 %vm675_vm3, %v4749_v54  ;;  %v465_v2 = vrot.slane %v464_v16, 4  ;;  %v491_v26 = vshll.u32 %v6643_v43, 16  ;;  %v495_v47 = vshrl.u32 %v6643_v43, 16 }
  0x6e   : > { %v501_v15 = vshll.u32 %v221_v46, 16  ;;  %v2691_v60 = vsel %vm6608_vm7, %v2689_v41, %v2690_v29  ;;  %v484_v24 = vrot.slane %v482_v13, 4  ;;  %v487_v17 = vrot.slane %v485_v63, 5  ;;  %v6676_v46 = vld [vmem:[%s8379_s1 + $0xe] sm:$0x3] }
  0x6f   : > { %v475_v4 = vrot.slane %v474_v55, 4  ;;  %v470_v9 = vsel %vm6342_vm4, %v465_v2, %v469_v37  ;;  %v4986_v11 = vcombine.low %v2688_v62, %v2691_v60  ;;  %v493_v5 = vrot.slane %v491_v26, 5  ;;  %v224_v55 = vld [vmem:[%s6316_s11 + $0x8c] sm:$0x1] }
  0x70   : > { %v497_v25 = vrot.slane %v495_v47, 4  ;;  %v488_v0 = vor.u32 %v487_v17, %v484_v24  ;;  %v503_v36 = vrot.slane %v501_v15, 5  ;;  %v4970_v29 = vrot.slane %v6394_v30, 9 }
  0x71   : > { %v480_v14 = vsel %vm6342_vm4, %v475_v4, %v479_v57  ;;  %5513 = vmatmul.mubr.msk.bf16.vlgmr.msra.gmra.mrb[0].mxu0 %vm675_vm3, %v4986_v11  ;;  %v2694_v16 = vrot.slane %v6401_v45, 5  ;;  %v2697_v62 = vrot.slane %v6406_v52, 5  ;;  %v506_v41 = vshrl.u32 %v6665_v27, 16  ;;  %v6702_v11 = vld [vmem:[%s6316_s11 + $0x94] sm:$0xf] }
  0x72   : > { %v4750_v37 = vcombine.low %v470_v9, %v480_v14  ;;  %v498_v54 = vor.u32 %v497_v25, %v493_v5  ;;  %5545 = vmatpush3.bf16.msra.mxu0 %v6374_v1  ;;  %v489_v57 = vrot.slane %v488_v0, 4  ;;  %v509_v30 = vshll.u32 %v6665_v27, 16  ;;  %v6699_v9 = vld [vmem:[%s6316_s11 + $0x90] sm:$0xf] }
  0x73   : > { %v515_v13 = vshll.u32 %v6668_v33, 16  ;;  %v2695_v45 = vsel %vm6608_vm7, %v4970_v29, %v2694_v16  ;;  %v2696_v2 = vrot.slane %v2694_v16, 4  ;;  %v519_v52 = vshrl.u32 %v6668_v33, 16  ;;  %5912 = vmatprep.subr.msk.bf16.mxu0 %vm724_vm0, %v6676_v46 }
  0x74   : > { %5359 = vmatmul.mubr.msk.bf16.gmra.mrb[16].mxu1 %vm675_vm3, %v4750_v37  ;;  %v499_v63 = vrot.slane %v498_v54, 4  ;;  %v494_v1 = vsel %vm6342_vm4, %v489_v57, %v493_v5  ;;  %v508_v26 = vrot.slane %v506_v41, 4  ;;  %v511_v47 = vrot.slane %v509_v30, 5 }
  0x75   : > { %v517_v15 = vrot.slane %v515_v13, 5  ;;  %v2698_v60 = vsel %vm6608_vm7, %v2696_v2, %v2697_v62  ;;  %v521_v24 = vrot.slane %v519_v52, 4  ;;  %v525_v17 = vshll.u32 %v224_v55, 16  ;;  %v6710_v62 = vld [vmem:[%s6316_s11 + $0x98] sm:$0x1] }
  0x76   : > { %v504_v4 = vsel %vm6342_vm4, %v499_v63, %v503_v36  ;;  %v4987_v14 = vcombine.low %v2695_v45, %v2698_v60  ;;  %v512_v0 = vor.u32 %v511_v47, %v508_v26  ;;  %v4971_v5 = vrot.slane %v6424_v21, 9  ;;  %v6729_v60 = vld [vmem:[%s6316_s11 + $0xa0] sm:$0xf] }
  0x77   : > { %v4751_v25 = vcombine.low %v494_v1, %v504_v4  ;;  %v522_v29 = vor.u32 %v521_v24, %v517_v15  ;;  %v527_v37 = vrot.slane %v525_v17, 5  ;;  %v2701_v54 = vrot.slane %v6430_v34, 5  ;;  %v6726_v4 = vld [vmem:[%s6316_s11 + $0x9c] sm:$0xf] }
  0x78   : > { %v2704_v36 = vrot.slane %v6439_v42, 5  ;;  %5516 = vmatprep.mubr.msk.bf16.mxu0 %vm675_vm3, %v4987_v14  ;;  %v513_v16 = vrot.slane %v512_v0, 4  ;;  %v530_v57 = vshrl.u32 %v6699_v9, 16  ;;  %v533_v55 = vshll.u32 %v6699_v9, 16 }
  0x79   : > { %5362 = vmatprep.mubr.msk.bf16.mxu1 %vm675_vm3, %v4751_v25  ;;  %v539_v21 = vshll.u32 %v6702_v11, 16  ;;  %v523_v41 = vrot.slane %v522_v29, 4  ;;  %v2702_v34 = vsel %vm6608_vm7, %v4971_v5, %v2701_v54  ;;  %v2703_v42 = vrot.slane %v2701_v54, 4  ;;  %v230_v54 = vld [vmem:[%s6316_s11 + $0xa4] sm:$0x1] }
  0x7a   : > { %v543_v30 = vshrl.u32 %v6702_v11, 16  ;;  %v518_v13 = vsel %vm6342_vm4, %v513_v16, %v517_v15  ;;  %v532_v63 = vrot.slane %v530_v57, 4  ;;  %v535_v45 = vrot.slane %v533_v55, 5 }
  0x7b   : > { %v541_v2 = vrot.slane %v539_v21, 5  ;;  %v528_v52 = vsel %vm6342_vm4, %v523_v41, %v527_v37  ;;  %v2705_v1 = vsel %vm6608_vm7, %v2703_v42, %v2704_v36  ;;  %v549_v47 = vshll.u32 %v6710_v62, 16 }
  0x7c   : > { %v545_v26 = vrot.slane %v543_v30, 4  ;;  %v4752_v24 = vcombine.low %v518_v13, %v528_v52  ;;  %v4988_v17 = vcombine.low %v2702_v34, %v2705_v1  ;;  %v536_v15 = vor.u32 %v535_v45, %v532_v63  ;;  %v6750_v52 = vld [vmem:[%s6316_s11 + $0xa8] sm:$0xf]  ;;  %v6753_v1 = vld [vmem:[%s6316_s11 + $0xac] sm:$0xf] }
  0x7d   : > { %v4972_v25 = vrot.slane %v6461_v10, 9  ;;  %v551_v0 = vrot.slane %v549_v47, 5  ;;  %v2708_v5 = vrot.slane %v6467_v19, 5  ;;  %v2711_v29 = vrot.slane %v6472_v31, 5  ;;  %8411 = vst [vmem:[#allocation6_spill] sm:$0xff] %v6750_v52 }
  0x7e   : > { %v546_v14 = vor.u32 %v545_v26, %v541_v2  ;;  %5363 = vmatmul.mubr.msk.bf16.gmra.mrb[20].mxu1 %vm675_vm3, %v4752_v24  ;;  %5517 = vmatmul.mubr.msk.bf16.gmra.mrb[4].mxu0 %vm675_vm3, %v4988_v17  ;;  %v537_v37 = vrot.slane %v536_v15, 4  ;;  %v554_v36 = vshrl.u32 %v6726_v4, 16  ;;  %v557_v16 = vshll.u32 %v6726_v4, 16 }
  0x7f   : > { %v563_v10 = vshll.u32 %v6729_v60, 16  ;;  %v2709_v19 = vsel %vm6608_vm7, %v4972_v25, %v2708_v5  ;;  %v2710_v55 = vrot.slane %v2708_v5, 4  ;;  %v567_v31 = vshrl.u32 %v6729_v60, 16  ;;  %v6761_v5 = vld [vmem:[%s6316_s11 + $0xb0] sm:$0x1] }
  0x80   : > { %v547_v57 = vrot.slane %v546_v14, 4  ;;  %v542_v21 = vsel %vm6342_vm4, %v537_v37, %v541_v2  ;;  %v556_v41 = vrot.slane %v554_v36, 4  ;;  %v559_v34 = vrot.slane %v557_v16, 5  ;;  %8412 = vst [vmem:[#allocation7_spill] sm:$0xff] %v6761_v5 }
  0x81   : > { %v565_v42 = vrot.slane %v563_v10, 5  ;;  %v2712_v13 = vsel %vm6608_vm7, %v2710_v55, %v2711_v29  ;;  %v569_v63 = vrot.slane %v567_v31, 4  ;;  %v573_v45 = vshll.u32 %v230_v54, 16 }
  0x82   : > { %v552_v30 = vsel %vm6342_vm4, %v547_v57, %v551_v0  ;;  %v4989_v47 = vcombine.low %v2709_v19, %v2712_v13  ;;  %v560_v24 = vor.u32 %v559_v34, %v556_v41  ;;  %v4973_v2 = vrot.slane %v6499_v8, 9  ;;  %v6777_v34 = vld [vmem:[%s6316_s11 + $0xb4] sm:$0xf] }
  0x83   : > { %v4753_v26 = vcombine.low %v542_v21, %v552_v30  ;;  %v570_v17 = vor.u32 %v569_v63, %v565_v42  ;;  %v575_v15 = vrot.slane %v573_v45, 5  ;;  %v2715_v25 = vrot.slane %v6502_v18, 5  ;;  %8413 = vst [vmem:[#allocation8_spill] sm:$0xff] %v6777_v34  ;;  %v6780_v30 = vld [vmem:[%s6316_s11 + $0xb8] sm:$0xf] }
  0x84   : > { %v2718_v14 = vrot.slane %v6508_v28, 5  ;;  %5520 = vmatprep.mubr.msk.bf16.mxu0 %vm675_vm3, %v4989_v47  ;;  %v561_v0 = vrot.slane %v560_v24, 4  ;;  %v578_v29 = vshrl.u32 %v6750_v52, 16  ;;  %v581_v37 = vshll.u32 %v6750_v52, 16  ;;  %8414 = vst [vmem:[#allocation9_spill] sm:$0xff] %v6780_v30 }
  0x85   : > { %5366 = vmatprep.mubr.msk.bf16.mxu1 %vm675_vm3, %v4753_v26  ;;  %v587_v8 = vshll.u32 %v6753_v1, 16  ;;  %v571_v54 = vrot.slane %v570_v17, 4  ;;  %v2716_v18 = vsel %vm6608_vm7, %v4973_v2, %v2715_v25  ;;  %v2717_v28 = vrot.slane %v2715_v25, 4 }
  0x86   : > { %v591_v36 = vshrl.u32 %v6753_v1, 16  ;;  %v566_v16 = vsel %vm6342_vm4, %v561_v0, %v565_v42  ;;  %v580_v10 = vrot.slane %v578_v29, 4  ;;  %v583_v57 = vrot.slane %v581_v37, 5 }
  0x87   : > { %v589_v19 = vrot.slane %v587_v8, 5  ;;  %v576_v55 = vsel %vm6342_vm4, %v571_v54, %v575_v15  ;;  %v2719_v31 = vsel %vm6608_vm7, %v2717_v28, %v2718_v14  ;;  %v597_v41 = vshll.u32 %v6761_v5, 16  ;;  %v6788_v15 = vld [vmem:[%s6316_s11 + $0xbc] sm:$0x1]  ;;  %v4878_v28 = vld [vmem:[%s6316_s11 + $0x6c] sm:$0xf] }
  0x88   : > { %v593_v21 = vrot.slane %v591_v36, 4  ;;  %v4754_v13 = vcombine.low %v566_v16, %v576_v55  ;;  %v4990_v63 = vcombine.low %v2716_v18, %v2719_v31  ;;  %v584_v42 = vor.u32 %v583_v57, %v580_v10  ;;  %8415 = vst [vmem:[#allocation10_spill] sm:$0xff] %v6788_v15  ;;  %v4879_v55 = vld [vmem:[%s6316_s11 + $0x70] sm:$0xf]  ;;  %v4880_v31 = vld [vmem:[%s6316_s11 + $0x74] sm:$0x1] }
  0x89   : > { %v4974_v45 = vrot.slane %v6533_v7, 9  ;;  %v599_v47 = vrot.slane %v597_v41, 5  ;;  %v2722_v24 = vrot.slane %v6536_v20, 5  ;;  %v2725_v2 = vrot.slane %v6543_v35, 5  ;;  %v6045_v5 = vld [vmem:[%s6316_s11 + $0x64] sm:$0xf] }
  0x8a   : > { %v594_v26 = vor.u32 %v593_v21, %v589_v19  ;;  %5367 = vmatmul.mubr.msk.bf16.gmra.mrb[24].mxu1 %vm675_vm3, %v4754_v13  ;;  %5521 = vmatmul.mubr.msk.bf16.gmra.mrb[8].mxu0 %vm675_vm3, %v4990_v63  ;;  %v585_v17 = vrot.slane %v584_v42, 4  ;;  %v602_v25 = vshrl.u32 %v6777_v34, 16  ;;  %v605_v14 = vshll.u32 %v6777_v34, 16 }
  0x8b   : > { %v611_v7 = vshll.u32 %v6780_v30, 16  ;;  %v2723_v20 = vsel %vm6608_vm7, %v4974_v45, %v2722_v24  ;;  %v2724_v35 = vrot.slane %v2722_v24, 4  ;;  %v615_v29 = vshrl.u32 %v6780_v30, 16 }
  0x8c   : > { %v595_v0 = vrot.slane %v594_v26, 4  ;;  %v590_v37 = vsel %vm6342_vm4, %v585_v17, %v589_v19  ;;  %v604_v8 = vrot.slane %v602_v25, 4  ;;  %v607_v54 = vrot.slane %v605_v14, 5 }
  0x8d   : > { %v613_v18 = vrot.slane %v611_v7, 5  ;;  %v2726_v16 = vsel %vm6608_vm7, %v2724_v35, %v2725_v2  ;;  %v617_v10 = vrot.slane %v615_v29, 4  ;;  %v621_v57 = vshll.u32 %v6788_v15, 16  ;;  %v6822_v35 = vld [vmem:[%s6316_s11] sm:$0xf] }
  0x8e   : > { %v600_v36 = vsel %vm6342_vm4, %v595_v0, %v599_v47  ;;  %v4991_v41 = vcombine.low %v2723_v20, %v2726_v16  ;;  %v608_v13 = vor.u32 %v607_v54, %v604_v8  ;;  %v4975_v19 = vrot.slane %v6567_v23, 9  ;;  %v6825_v29 = vld [vmem:[%s6316_s11 + $0x4] sm:$0xf]  ;;  %v4881_v8 = vld [vmem:[%s6316_s11 + $0x78] sm:$0xf] }
  0x8f   : > { %v4755_v21 = vcombine.low %v590_v37, %v600_v36  ;;  %v618_v63 = vor.u32 %v617_v10, %v613_v18  ;;  %v623_v42 = vrot.slane %v621_v57, 5  ;;  %v2729_v45 = vrot.slane %v6572_v39, 5  ;;  %v4882_v54 = vld [vmem:[%s6316_s11 + $0x7c] sm:$0xf]  ;;  %v4883_v16 = vld [vmem:[%s6316_s11 + $0x80] sm:$0x1] }
  0x90   : > { %v2732_v26 = vrot.slane %v6577_v59, 5  ;;  %5524 = vmatprep.mubr.msk.bf16.mxu0 %vm675_vm3, %v4991_v41  ;;  %v609_v47 = vrot.slane %v608_v13, 4  ;;  %v4976_v24 = vrot.slane %v4878_v28, 9  ;;  %v2736_v2 = vrot.slane %v4879_v55, 5  ;;  %v4884_v10 = vld [vmem:[%s6316_s11 + $0x84] sm:$0xf] }
  0x91   : > { %5370 = vmatprep.mubr.msk.bf16.mxu1 %vm675_vm3, %v4755_v21  ;;  %v2739_v17 = vrot.slane %v4880_v31, 5  ;;  %v619_v25 = vrot.slane %v618_v63, 4  ;;  %v2730_v23 = vsel %vm6608_vm7, %v4975_v19, %v2729_v45  ;;  %v2731_v39 = vrot.slane %v2729_v45, 4  ;;  %v4885_v55 = vld [vmem:[%s6316_s11 + $0x88] sm:$0xf] }
  0x92   : > { %v614_v59 = vsel %vm6342_vm4, %v609_v47, %v613_v18  ;;  %v2737_v14 = vsel %vm6608_vm7, %v4976_v24, %v2736_v2  ;;  %v2738_v7 = vrot.slane %v2736_v2, 4  ;;  %v4773_v37 = vcombine.low %v6822_v35, %v6825_v29  ;;  %v4886_v41 = vld [vmem:[%s6316_s11 + $0x8c] sm:$0x1]  ;;  %v4888_v13 = vld [vmem:[%s6316_s11 + $0x94] sm:$0xf] }
  0x93   : > { %v624_v0 = vsel %vm6342_vm4, %v619_v25, %v623_v42  ;;  %v2733_v20 = vsel %vm6608_vm7, %v2731_v39, %v2732_v26  ;;  %v4977_v31 = vrot.slane %v4881_v8, 9  ;;  %v2743_v21 = vrot.slane %v4882_v54, 5  ;;  %v4887_v42 = vld [vmem:[%s6316_s11 + $0x90] sm:$0xf]  ;;  %v4889_v45 = vld [vmem:[%s6316_s11 + $0x98] sm:$0x1] }
  0x94   : > { %v4756_v18 = vcombine.low %v614_v59, %v624_v0  ;;  %v4992_v28 = vcombine.low %v2730_v23, %v2733_v20  ;;  %v2740_v36 = vsel %vm6608_vm7, %v2738_v7, %v2739_v17  ;;  %v2746_v19 = vrot.slane %v4883_v16, 5  ;;  %v4890_v2 = vld [vmem:[%s6316_s11 + $0x9c] sm:$0xf]  ;;  %v4891_v17 = vld [vmem:[%s6316_s11 + $0xa0] sm:$0xf] }
  0x95   : > { %v4993_v57 = vcombine.low %v2737_v14, %v2740_v36  ;;  %v4978_v63 = vrot.slane %v4884_v10, 9  ;;  %v2744_v26 = vsel %vm6608_vm7, %v4977_v31, %v2743_v21  ;;  %v2745_v47 = vrot.slane %v2743_v21, 4  ;;  %v6849_v25 = vld [vmem:[%s6316_s11 + $0xc] sm:$0xf]  ;;  %v6852_v23 = vld [vmem:[%s6316_s11 + $0x10] sm:$0xf] }
  0x96   : > { %5371 = vmatmul.mubr.msk.bf16.gmra.mrb[28].mxu1 %vm675_vm3, %v4756_v18  ;;  %5525 = vmatmul.mubr.msk.bf16.gmra.mrb[12].mxu0 %vm675_vm3, %v4992_v28  ;;  %v2750_v24 = vrot.slane %v4885_v55, 5  ;;  %v4774_v39 = vcombine.low %v6849_v25, %v6852_v23  ;;  %v6024_v59 = vld [vmem:[%s8379_s1 + $0x4] sm:$0x3]  ;;  %v2753_v7 = vrot.slane %v4886_v41, 5  ;;  %v2757_v0 = vrot.slane %v4888_v13, 5 }
  0x97   : > { %5376 = vmatprep.mubr.msk.bf16.mxu1 %vm675_vm3, %v4773_v37  ;;  %5528 = vmatprep.mubr.msk.bf16.mxu0 %vm675_vm3, %v4993_v57  ;;  %v1411_v14 = vsel %vm724_vm0, %v6024_v59, 0  ;;  %v4892_v20 = vld [vmem:[%s6316_s11 + $0xa4] sm:$0x1]  ;;  %v2747_v37 = vsel %vm6608_vm7, %v2745_v47, %v2746_v19  ;;  %v6864_v8 = vld [vmem:[%s6316_s11 + $0x18] sm:$0xf]  ;;  %v4979_v10 = vrot.slane %v4887_v42, 9 }
  0x98   : > { %v6867_v54 = vld [vmem:[%s6316_s11 + $0x1c] sm:$0xf]  ;;  %v2751_v28 = vsel %vm6608_vm7, %v4978_v63, %v2750_v24  ;;  %v2752_v36 = vrot.slane %v2750_v24, 4  ;;  %v4994_v16 = vcombine.low %v2744_v26, %v2747_v37  ;;  %v2759_v57 = vrot.slane %v2757_v0, 4  ;;  %v4894_v19 = vld [vmem:[%s6316_s11 + $0xac] sm:$0xf] }
  0x99   : > { %v4775_v18 = vcombine.low %v6864_v8, %v6867_v54  ;;  %v2760_v55 = vrot.slane %v4889_v45, 5  ;;  %v4980_v21 = vrot.slane %v4890_v2, 9  ;;  %v2764_v41 = vrot.slane %v4891_v17, 5  ;;  %v4897_v59 = vld [vmem:[%s6316_s11 + $0xb8] sm:$0xf] }
  0x9a   : > { %v2754_v31 = vsel %vm6608_vm7, %v2752_v36, %v2753_v7  ;;  %v2767_v13 = vrot.slane %v4892_v20, 5  ;;  %v6880_v63 = vld [vmem:[%s8379_s1 + $0x6] sm:$0x3]  ;;  %v2758_v45 = vsel %vm6608_vm7, %v4979_v10, %v2757_v0  ;;  %v2771_v24 = vrot.slane %v4894_v19, 5  ;;  %v4895_v7 = vld [vmem:[%s6316_s11 + $0xb0] sm:$0x1] }
  0x9b   : > { %v4995_v47 = vcombine.low %v2751_v28, %v2754_v31  ;;  %v2766_v42 = vrot.slane %v2764_v41, 4  ;;  %v2761_v26 = vsel %vm6608_vm7, %v2759_v57, %v2760_v55  ;;  %v2765_v2 = vsel %vm6608_vm7, %v4980_v21, %v2764_v41  ;;  %v4896_v0 = vld [vmem:[%s6316_s11 + $0xb4] sm:$0xf]  ;;  %v4898_v20 = vld [vmem:[%s6316_s11 + $0xbc] sm:$0x1] }
  0x9c   : > { %v6901_v37 = vld [vmem:[%s6316_s11 + $0x24] sm:$0xf]  ;;  %v4996_v36 = vcombine.low %v2758_v45, %v2761_v26  ;;  %v2773_v55 = vrot.slane %v2771_v24, 4  ;;  %v2774_v31 = vrot.slane %v4895_v7, 5  ;;  %v4982_v21 = vrot.slane %v4896_v0, 9 }
  0x9d   : > { %v2768_v17 = vsel %vm6608_vm7, %v2766_v42, %v2767_v13  ;;  %v2781_v13 = vrot.slane %v4898_v20, 5  ;;  %v4900_v19 = vld [vmem:[%s6316_s11 + $0xc4] sm:$0xf]  ;;  %v4899_v45 = vld [vmem:[%s6316_s11 + $0xc0] sm:$0xf] }
  0x9e   : > { %5377 = vmatmul.mubr.msk.bf16.vlgmr.msra.gmra.mrb[0].mxu1 %vm675_vm3, %v4774_v39  ;;  %5529 = vmatmul.mubr.msk.bf16.gmra.mrb[16].mxu0 %vm675_vm3, %v4994_v16  ;;  %v4893_v39 = vld [vmem:[%s6316_s11 + $0xa8] sm:$0xf]  ;;  %v4777_v16 = vcombine.low %v6443_v44, %v6449_v56  ;;  %v4997_v10 = vcombine.low %v2765_v2, %v2768_v17  ;;  %v2775_v56 = vsel %vm6608_vm7, %v2773_v55, %v2774_v31  ;;  %v4983_v7 = vrot.slane %v4899_v45, 9 }
  0x9f   : > { %5409 = vmatpush3.bf16.msra.mxu1 %v1411_v14  ;;  %5380 = vmatprep.mubr.msk.bf16.mxu1 %vm675_vm3, %v4775_v18  ;;  %v2778_v14 = vrot.slane %v4897_v59, 5  ;;  %v6904_v18 = vld [vmem:[%s6316_s11 + $0x28] sm:$0xf]  ;;  %v4981_v57 = vrot.slane %v4893_v39, 9  ;;  %v4778_v2 = vcombine.low %v6480_v50, %v6486_v51  ;;  %v4783_v55 = vcombine.low %v6638_v58, %v6643_v43  ;;  %v6987_v58 = vld [vmem:[%s6316_s11 + $0x40] sm:$0xf] }
  0xa0   : > { %5532 = vmatprep.mubr.msk.bf16.mxu0 %vm675_vm3, %v4995_v47  ;;  %5907 = vmatprep.subr.msk.bf16.mxu1 %vm724_vm0, %v6880_v63  ;;  %v4776_v28 = vcombine.low %v6901_v37, %v6904_v18  ;;  %v2785_v47 = vrot.slane %v4900_v19, 5  ;;  %v4901_v26 = vld [vmem:[%s6316_s11 + $0xc8] sm:$0x1]  ;;  %v3945_v31 = vsel %vm724_vm0, %v6676_v46, 0  ;;  %v4784_v45 = vcombine.low %v6665_v27, %v6668_v33 }
  0xa1   : > { %v2780_v41 = vrot.slane %v2778_v14, 4  ;;  %v2772_v44 = vsel %vm6608_vm7, %v4981_v57, %v2771_v24  ;;  %v2779_v59 = vsel %vm6608_vm7, %v4982_v21, %v2778_v14  ;;  %v4779_v24 = vcombine.low %v6516_v40, %v6519_v48  ;;  %v6938_v40 = vld [vmem:[%s6316_s11 + $0x18] sm:$0xf]  ;;  %v6941_v48 = vld [vmem:[%s6316_s11 + $0x1c] sm:$0xf] }
  0xa2   : > { %v4998_v17 = vcombine.low %v2772_v44, %v2775_v56  ;;  %v2787_v0 = vrot.slane %v2785_v47, 4  ;;  %v2788_v20 = vrot.slane %v4901_v26, 5  ;;  %v2786_v50 = vsel %vm6608_vm7, %v4983_v7, %v2785_v47  ;;  %v6991_v46 = vld [vmem:[%s6316_s11 + $0x48] sm:$0xf]  ;;  %v7004_v47 = vld [vmem:[%s6316_s11 + $0x14] sm:$0x1] }
  0xa3   : > { %v2782_v42 = vsel %vm6608_vm7, %v2780_v41, %v2781_v13  ;;  %v4780_v14 = vcombine.low %v6550_v53, %v6556_v61  ;;  %v6957_v53 = vld [vmem:[%s6316_s11 + $0x28] sm:$0xf]  ;;  %v6960_v61 = vld [vmem:[%s6316_s11 + $0x30] sm:$0xf]  ;;  %v6994_v13 = vld [vmem:[%s6316_s11 + $0x4c] sm:$0xf] }
  0xa4   : > { %v4999_v39 = vcombine.low %v2779_v59, %v2782_v42  ;;  %v2789_v51 = vsel %vm6608_vm7, %v2787_v0, %v2788_v20  ;;  %v6978_v41 = vld [vmem:[%s8379_s1 + $0x10] sm:$0x3]  ;;  %v6999_v19 = vld [vmem:[%s6316_s11 + $0x8] sm:$0x1]  ;;  %v1209_v56 = vrot.slane %v6852_v23, 5  ;;  %v1212_v59 = vrot.slane %v7004_v47, 5 }
  0xa5   : > { %v1205_v44 = vrot.slane %v6999_v19, 5  ;;  %v4785_v23 = vcombine.low %v6699_v9, %v6702_v11  ;;  %v7022_v7 = vld [vmem:[%s6316_s11 + $0x58] sm:$0xf]  ;;  %v1216_v9 = vrot.slane %v6867_v54, 5  ;;  %v7091_v33 = vld [vmem:[%s6316_s11 + $0x88] sm:$0xf] }
  0xa6   : > { %5381 = vmatmul.mubr.msk.bf16.gmra.mrb[4].mxu1 %vm675_vm3, %v4776_v28  ;;  %5533 = vmatmul.mubr.msk.bf16.gmra.mrb[20].mxu0 %vm675_vm3, %v4996_v36  ;;  %v5000_v28 = vcombine.low %v2786_v50, %v2789_v51  ;;  %v4781_v36 = vcombine.low %v6587_v6, %v6590_v22  ;;  %v6963_v6 = vld [vmem:[%s6316_s11 + $0x34] sm:$0xf]  ;;  %v4782_v22 = vcombine.low %v6604_v49, %v6620_v38  ;;  %v6984_v49 = vld [vmem:[%s6316_s11 + $0x3c] sm:$0xf]  ;;  %v7029_v50 = vld [vmem:[%s6316_s11 + $0x60] sm:$0xf] }
  0xa7   : > { %5384 = vmatprep.mubr.msk.bf16.mxu1 %vm675_vm3, %v4777_v16  ;;  %5536 = vmatprep.mubr.msk.bf16.mxu0 %vm675_vm3, %v4997_v10  ;;  %v5066_v16 = vcombine.low %v6938_v40, %v6941_v48  ;;  %v6954_v10 = vld [vmem:[%s6316_s11 + $0x24] sm:$0xf]  ;;  %v5068_v21 = vcombine.low %v6960_v61, %v6963_v6  ;;  %v5069_v26 = vcombine.low %v6984_v49, %v6987_v58  ;;  %v4807_v27 = vrot.slane %v6864_v8, 9  ;;  %v7115_v0 = vld [vmem:[%s6316_s11 + $0x94] sm:$0xf] }
  0xa8   : > { %v5067_v57 = vcombine.low %v6954_v10, %v6957_v53  ;;  %8416 = vst [vmem:[#allocation11_spill] sm:$0xff] %v7029_v50  ;;  %v4788_v51 = vcombine.low %v6777_v34, %v6780_v30  ;;  %v7123_v19 = vsel %vm724_vm0, %v6880_v63, 0  ;;  %v7141_v8 = vld [vmem:[%s6316_s11 + $0x9c] sm:$0xf]  ;;  %v7153_v54 = vld [vmem:[%s6316_s11 + $0xa8] sm:$0xf] }
  0xa9   : > { %v6036_v42 = vld [vmem:[%s6316_s11 + $0x40] sm:$0xf]  ;;  %v7222_v34 = vld [vmem:[%s6316_s11 + $0xc4] sm:$0xf] }
  0xae   : > { %5385 = vmatmul.mubr.msk.bf16.gmra.mrb[8].mxu1 %vm675_vm3, %v4778_v2  ;;  %5537 = vmatmul.mubr.msk.bf16.gmra.mrb[24].mxu0 %vm675_vm3, %v4998_v17  ;;  %v7105_v17 = vld [vmem:[%s6316_s11 + $0x90] sm:$0xf]  ;;  %v7158_v2 = vld [vmem:[%s6316_s11 + $0xac] sm:$0xf] }
  0xaf   : > { %5388 = vmatprep.mubr.msk.bf16.mxu1 %vm675_vm3, %v4779_v24  ;;  %5540 = vmatprep.mubr.msk.bf16.mxu0 %vm675_vm3, %v4999_v39  ;;  %v5070_v24 = vcombine.low %v6991_v46, %v6994_v13  ;;  %v7019_v39 = vld [vmem:[%s6316_s11 + $0x54] sm:$0xf]  ;;  %8422 = vst [vmem:[#allocation17_spill] sm:$0xff] %v7105_v17 }
  0xb0   : > { %v5071_v47 = vcombine.low %v7019_v39, %v7022_v7 }
  0xb6   : > { %5389 = vmatmul.mubr.msk.bf16.gmra.mrb[12].mxu1 %vm675_vm3, %v4780_v14  ;;  %5541 = vmatmul.mubr.msk.bf16.gmra.mrb[28].mxu0 %vm675_vm3, %v5000_v28  ;;  %v1237_v28 = vrot.slane %v6036_v42, 5  ;;  %v6037_v42 = vld [vmem:[%s6316_s11 + $0x4c] sm:$0xf] }
  0xb7   : > { %5392 = vmatprep.mubr.msk.bf16.mxu1 %vm675_vm3, %v4781_v36  ;;  %5546 = vmatprep.mubr.msk.bf16.mxu0 %vm675_vm3, %v5066_v16  ;;  %v7036_v36 = vld [vmem:[%s6316_s11 + $0x64] sm:$0xf] }
  0xbe   : > { %5393 = vmatmul.mubr.msk.bf16.gmra.mrb[16].mxu1 %vm675_vm3, %v4782_v22  ;;  %5547 = vmatmul.mubr.msk.bf16.vlgmr.msra.gmra.mrb[0].mxu0 %vm675_vm3, %v5067_v57  ;;  %v7070_v22 = vld [vmem:[%s6316_s11 + $0x7c] sm:$0xf]  ;;  %v1211_v57 = vrot.slane %v1209_v56, 4 }
  0xbf   : > { %5579 = vmatpush3.bf16.msra.mxu0 %v3945_v31  ;;  %5396 = vmatprep.mubr.msk.bf16.mxu1 %vm675_vm3, %v4783_v55  ;;  %v1202_v55 = vrot.slane %v6825_v29, 5  ;;  %v7062_v31 = vld [vmem:[%s6316_s11 + $0x70] sm:$0xf]  ;;  %8420 = vst [vmem:[#allocation15_spill] sm:$0xff] %v7070_v22  ;;  %v4806_v29 = vrot.slane %v6849_v25, 9 }
  0xc0   : > { %5550 = vmatprep.mubr.msk.bf16.mxu0 %vm675_vm3, %v5068_v21  ;;  %5913 = vmatprep.subr.msk.bf16.mxu0 %vm724_vm0, %v6978_v41  ;;  %v4786_v21 = vcombine.low %v6726_v4, %v6729_v60  ;;  %8418 = vst [vmem:[#allocation13_spill] sm:$0xff] %v7062_v31  ;;  %v7065_v4 = vld [vmem:[%s6316_s11 + $0x78] sm:$0xf]  ;;  %v7083_v25 = vld [vmem:[%s6316_s11 + $0x84] sm:$0xf]  ;;  %v7101_v16 = vsel %vm6608_vm7, %v1211_v57, %v1212_v59  ;;  %v1223_v59 = vrot.slane %v6904_v18, 5 }
  0xc1   : > { %8419 = vst [vmem:[#allocation14_spill] sm:$0xff] %v7065_v4  ;;  %v1204_v14 = vrot.slane %v1202_v55, 4  ;;  %8421 = vst [vmem:[#allocation16_spill] sm:$0xff] %v7083_v25  ;;  %v7097_v20 = vsel %vm6608_vm7, %v4806_v29, %v1209_v56  ;;  %v1218_v56 = vrot.slane %v1216_v9, 4  ;;  %v6035_v18 = vld [vmem:[%s6316_s11 + $0x38] sm:$0x1] }
  0xc6   : > { %5397 = vmatmul.mubr.msk.bf16.gmra.mrb[20].mxu1 %vm675_vm3, %v4784_v45  ;;  %5551 = vmatmul.mubr.msk.bf16.gmra.mrb[4].mxu0 %vm675_vm3, %v5069_v26  ;;  %v7053_v26 = vld [vmem:[%s6316_s11 + $0x6c] sm:$0xf]  ;;  %v4805_v45 = vrot.slane %v6822_v35, 9 }
  0xc7   : > { %5400 = vmatprep.mubr.msk.bf16.mxu1 %vm675_vm3, %v4785_v23  ;;  %5554 = vmatprep.mubr.msk.bf16.mxu0 %vm675_vm3, %v5070_v24  ;;  %8417 = vst [vmem:[#allocation12_spill] sm:$0xff] %v7053_v26  ;;  %v4787_v23 = vcombine.low %v6750_v52, %v6753_v1  ;;  %v5072_v24 = vcombine.low %v7029_v50, %v7036_v36  ;;  %v8425_v52 = vshll.u32 %v6938_v40, 16 }
  0xc8   : > { %v5073_v35 = vcombine.low %v7053_v26, %v7062_v31  ;;  %v1203_v60 = vsel %vm6608_vm7, %v4805_v45, %v1202_v55  ;;  %v1206_v55 = vsel %vm6608_vm7, %v1204_v14, %v1205_v44  ;;  %v6031_v45 = vld [vmem:[%s6316_s11 + $0x20] sm:$0x1]  ;;  %v6032_v14 = vld [vmem:[%s6316_s11 + $0x34] sm:$0xf]  ;;  %v1258_v31 = vrot.slane %v6045_v5, 5 }
  0xc9   : > { %v1219_v29 = vrot.slane %v6031_v45, 5  ;;  %v1230_v57 = vrot.slane %v6032_v14, 5  ;;  %v4822_v63 = vcombine.low %v1203_v60, %v1206_v55  ;;  %v4808_v14 = vrot.slane %v6901_v37, 9  ;;  %v6033_v55 = vld [vmem:[%s6316_s11 + $0x2c] sm:$0x1] }
  0xca   : > { %v1225_v60 = vrot.slane %v1223_v59, 4  ;;  %v1233_v37 = vrot.slane %v6035_v18, 5  ;;  %v6040_v45 = vld [vmem:[%s6316_s11 + $0x58] sm:$0xf]  ;;  %v6043_v26 = vld [vmem:[%s6316_s11 + $0x54] sm:$0xf] }
  0xcb   : > { %v1232_v44 = vrot.slane %v1230_v57, 4  ;;  %v7170_v18 = vsel %vm6608_vm7, %v4808_v14, %v1223_v59  ;;  %v7187_v14 = vld [vmem:[%s6316_s11 + $0xb4] sm:$0xf]  ;;  %v4812_v30 = vrot.slane %v6043_v26, 9  ;;  %v8426_v5 = vshrl.u32 %v6941_v48, 16 }
  0xce   : > { %5401 = vmatmul.mubr.msk.bf16.gmra.mrb[24].mxu1 %vm675_vm3, %v4786_v21  ;;  %5555 = vmatmul.mubr.msk.bf16.gmra.mrb[8].mxu0 %vm675_vm3, %v5071_v47  ;;  %v7144_v21 = vld [vmem:[%s6316_s11 + $0xa0] sm:$0xf]  ;;  %v1226_v47 = vrot.slane %v6033_v55, 5 }
  0xcf   : > { %5404 = vmatprep.mubr.msk.bf16.mxu1 %vm675_vm3, %v4787_v23  ;;  %5558 = vmatprep.mubr.msk.bf16.mxu0 %vm675_vm3, %v5072_v24  ;;  %v7135_v24 = vsel %vm6608_vm7, %v4807_v27, %v1216_v9  ;;  %v7148_v23 = vsel %vm6608_vm7, %v1218_v56, %v1219_v29  ;;  %v6034_v27 = vld [vmem:[%s6316_s11 + $0x30] sm:$0xf]  ;;  %v6039_v56 = vld [vmem:[%s6316_s11 + $0x44] sm:$0x1] }
  0xd0   : > { %v4809_v9 = vrot.slane %v6034_v27, 9  ;;  %v7178_v27 = vsel %vm6608_vm7, %v1225_v60, %v1226_v47  ;;  %v6038_v47 = vld [vmem:[%s6316_s11 + $0x3c] sm:$0xf]  ;;  %v1240_v59 = vrot.slane %v6039_v56, 5  ;;  %v7214_v56 = vld [vmem:[%s6316_s11 + $0xc0] sm:$0xf] }
  0xd1   : > { %v4810_v60 = vrot.slane %v6038_v47, 9  ;;  %v6041_v47 = vld [vmem:[%s6316_s11 + $0x48] sm:$0xf] }
  0xd2   : > { %v7182_v29 = vsel %vm6608_vm7, %v4809_v9, %v1230_v57  ;;  %v7200_v57 = vsel %vm6608_vm7, %v1232_v44, %v1233_v37  ;;  %v1239_v9 = vrot.slane %v1237_v28, 4  ;;  %v4811_v15 = vrot.slane %v6041_v47, 9 }
  0xd3   : > { %v7226_v37 = vsel %vm6608_vm7, %v4810_v60, %v1237_v28  ;;  %v3468_v28 = vrot.slane %v8425_v52, 5  ;;  %v8428_v52 = vcombine.low %v7083_v25, %v7091_v33 }
  0xd4   : > { %v7230_v47 = vsel %vm6608_vm7, %v1239_v9, %v1240_v59  ;;  %v7246_v59 = vld [vmem:[%s6316_s11 + $0xcc] sm:$0xf]  ;;  %v3478_v9 = vrot.slane %v8426_v5, 4 }
  0xd6   : > { %5405 = vmatmul.mubr.msk.bf16.gmra.mrb[28].mxu1 %vm675_vm3, %v4788_v51  ;;  %5559 = vmatmul.mubr.msk.bf16.gmra.mrb[12].mxu0 %vm675_vm3, %v5073_v35  ;;  %v1244_v51 = vrot.slane %v6037_v42, 5  ;;  %v8423_v35 = vcombine.low %v7065_v4, %v7070_v22  ;;  %v3472_v42 = vshll.u32 %v6941_v48, 16  ;;  %v6042_v4 = vld [vmem:[%s6316_s11 + $0x50] sm:$0x1]  ;;  %v6044_v22 = vld [vmem:[%s6316_s11 + $0x5c] sm:$0x1] }
  0xd7   : > { %5410 = vmatprep.mubr.msk.bf16.mxu1 %vm675_vm3, %v4822_v63  ;;  %v1247_v44 = vrot.slane %v6042_v4, 5  ;;  %v1254_v55 = vrot.slane %v6044_v22, 5  ;;  %v8424_v4 = vshrl.u32 %v6938_v40, 16  ;;  %v7267_v48 = vld [vmem:[%s6316_s11 + $0xd0] sm:$0xf] }
  0xd8   : > { %5562 = vmatprep.mubr.msk.bf16.mxu0 %vm675_vm3, %v8423_v35  ;;  %v1251_v35 = vrot.slane %v6040_v45, 5  ;;  %v1246_v45 = vrot.slane %v1244_v51, 4  ;;  %v7241_v60 = vsel %vm6608_vm7, %v4811_v15, %v1244_v51  ;;  %v7248_v22 = vrot.slane %v3472_v42, 5  ;;  %v7270_v51 = vld [vmem:[%s6316_s11 + $0x20] sm:$0x1] }
  0xd9   : > { %v3465_v50 = vrot.slane %v8424_v4, 4  ;;  %v8427_v4 = vcombine.low %v7097_v20, %v7101_v16  ;;  %8429 = vst [vmem:[#allocation18_spill] sm:$0xff] %v7270_v51  ;;  %v1265_v20 = vrot.slane %v6620_v38, 5  ;;  %v3496_v16 = vshll.u32 %v6957_v53, 16  ;;  %v6050_v15 = vld [vmem:[%s6316_s11 + $0x74] sm:$0x1] }
  0xda   : > { %v1253_v63 = vrot.slane %v1251_v35, 4  ;;  %v7264_v40 = vsel %vm6608_vm7, %v1246_v45, %v1247_v44  ;;  %v8430_v42 = vcombine.low %v7135_v24, %v7148_v23  ;;  %v7281_v5 = vsel %vm6608_vm7, %v4812_v30, %v1251_v35  ;;  %v6046_v44 = vld [vmem:[%s6316_s11 + $0x60] sm:$0xf]  ;;  %v6047_v24 = vld [vmem:[%s6316_s11 + $0x68] sm:$0x1] }
  0xdb   : > { %v4813_v45 = vrot.slane %v6046_v44, 9  ;;  %v8432_v38 = vshll.u32 %v6954_v10, 16  ;;  %v1260_v23 = vrot.slane %v1258_v31, 4  ;;  %v1261_v35 = vrot.slane %v6047_v24, 5  ;;  %v7308_v24 = vld [vmem:[%s6316_s11 + $0x2c] sm:$0x1] }
  0xdc   : > { %v7294_v30 = vsel %vm6608_vm7, %v1253_v63, %v1254_v55  ;;  %v1267_v63 = vrot.slane %v1265_v20, 4 }
  0xdd   : > { %v3492_v26 = vrot.slane %v8432_v38, 5  ;;  %v3482_v38 = vshll.u32 %v7270_v51, 16  ;;  %v1272_v51 = vrot.slane %v6643_v43, 5 }
  0xde   : > { %5411 = vmatmul.mubr.msk.bf16.vlgmr.msra.gmra.mrb[0].mxu1 %vm675_vm3, %v8427_v4  ;;  %5563 = vmatmul.mubr.msk.bf16.gmra.mrb[16].mxu0 %vm675_vm3, %v8428_v52  ;;  %v8431_v4 = vshrl.u32 %v6954_v10, 16  ;;  %v6048_v10 = vld [vmem:[%s8379_s1 + $0x8] sm:$0x3] }
  0xdf   : > { %5443 = vmatpush3.bf16.msra.mxu1 %v7123_v19  ;;  %5414 = vmatprep.mubr.msk.bf16.mxu1 %vm675_vm3, %v8430_v42  ;;  %v8433_v19 = vcombine.low %v7105_v17, %v7115_v0  ;;  %v3469_v42 = vor.u32 %v3468_v28, %v3465_v50  ;;  %v1268_v17 = vrot.slane %v6050_v15, 5  ;;  %v7310_v50 = vrot.slane %v3496_v16, 5 }
  0xe0   : > { %v3489_v52 = vrot.slane %v8431_v4, 4  ;;  %5909 = vmatprep.subr.msk.bf16.mxu1 %vm724_vm0, %v6048_v10  ;;  %v3479_v4 = vor.u32 %v3478_v9, %v7248_v22  ;;  %v8434_v28 = vshrl.u32 %v6957_v53, 16  ;;  %v4828_v10 = vcombine.low %v7241_v60, %v7264_v40  ;;  %v6056_v9 = vld [vmem:[%s6316_s11 + $0x90] sm:$0xf] }
  0xe1   : > { %5566 = vmatprep.mubr.msk.bf16.mxu0 %vm675_vm3, %v8433_v19  ;;  %v6049_v19 = vld [vmem:[%s6316_s11 + $0x6c] sm:$0xf]  ;;  %v7325_v15 = vsel %vm6608_vm7, %v1260_v23, %v1261_v35  ;;  %v7327_v53 = vrot.slane %v3469_v42, 4  ;;  %v3520_v16 = vshll.u32 %v6963_v6, 16  ;;  %v7332_v40 = vrot.slane %v3482_v38, 5 }
  0xe2   : > { %v4814_v55 = vrot.slane %v6049_v19, 9  ;;  %v3502_v25 = vrot.slane %v8434_v28, 4  ;;  %v3493_v44 = vor.u32 %v3492_v26, %v3489_v52  ;;  %v7321_v19 = vsel %vm6608_vm7, %v4813_v45, %v1258_v31  ;;  %v6051_v38 = vld [vmem:[%s6316_s11 + $0x78] sm:$0xf] }
  0xe3   : > { %v7330_v60 = vrot.slane %v3479_v4, 4  ;;  %v3506_v31 = vshll.u32 %v7308_v24, 16  ;;  %v8435_v26 = vcombine.low %v7170_v18, %v7178_v27  ;;  %v8436_v45 = vcombine.low %v7141_v8, %v7144_v21 }
  0xe4   : > { %v7336_v43 = vsel %vm6608_vm7, %v4814_v55, %v1265_v20  ;;  %v7349_v52 = vsel %vm6608_vm7, %v1267_v63, %v1268_v17  ;;  %v3503_v20 = vor.u32 %v3502_v25, %v7310_v50  ;;  %v8437_v23 = vshrl.u32 %v6960_v61, 16  ;;  %v6052_v63 = vld [vmem:[%s6316_s11 + $0x80] sm:$0x1] }
  0xe5   : > { %v8438_v42 = vshll.u32 %v6960_v61, 16  ;;  %v8439_v27 = vcombine.low %v7182_v29, %v7200_v57  ;;  %v8440_v18 = vcombine.low %v7153_v54, %v7158_v2  ;;  %v3494_v17 = vrot.slane %v3493_v44, 4  ;;  %v7444_v61 = vld [vmem:[%s6316_s11 + $0x50] sm:$0x1] }
  0xe6   : > { %5415 = vmatmul.mubr.msk.bf16.gmra.mrb[4].mxu1 %vm675_vm3, %v8435_v26  ;;  %5567 = vmatmul.mubr.msk.bf16.gmra.mrb[20].mxu0 %vm675_vm3, %v8436_v45  ;;  %v3513_v35 = vrot.slane %v8437_v23, 4  ;;  %v4815_v55 = vrot.slane %v6051_v38, 9  ;;  %v1274_v25 = vrot.slane %v1272_v51, 4  ;;  %v1275_v28 = vrot.slane %v6052_v63, 5  ;;  %v7367_v26 = vld [vmem:[%s6316_s11 + $0x38] sm:$0x1] }
  0xe7   : > { %v3516_v4 = vrot.slane %v8438_v42, 5  ;;  %5418 = vmatprep.mubr.msk.bf16.mxu1 %vm675_vm3, %v8439_v27  ;;  %5570 = vmatprep.mubr.msk.bf16.mxu0 %vm675_vm3, %v8440_v18  ;;  %8441 = vst [vmem:[#allocation19_spill] sm:$0xff] %v7367_v26  ;;  %v3475_v29 = vsel %vm6342_vm4, %v7327_v53, %v7248_v22  ;;  %v7375_v57 = vrot.slane %v3520_v16, 5  ;;  %v8442_v44 = vshrl.u32 %v6963_v6, 16 }
  0xe8   : > { %v3485_v23 = vsel %vm6342_vm4, %v7330_v60, %v7332_v40  ;;  %v7387_v27 = vsel %vm724_vm0, %v6978_v41, 0  ;;  %v3544_v22 = vshll.u32 %v6987_v58, 16  ;;  %v3504_v53 = vrot.slane %v3503_v20, 4 }
  0xe9   : > { %v3526_v45 = vrot.slane %v8442_v44, 4  ;;  %v3508_v16 = vrot.slane %v3506_v31, 5  ;;  %v3517_v6 = vor.u32 %v3516_v4, %v3513_v35  ;;  %v3530_v18 = vshll.u32 %v7367_v26, 16  ;;  %v6053_v31 = vld [vmem:[%s6316_s11 + $0x88] sm:$0xf] }
  0xea   : > { %v3499_v60 = vsel %vm6342_vm4, %v3494_v17, %v7310_v50  ;;  %v7396_v40 = vsel %vm6608_vm7, %v4815_v55, %v1272_v51  ;;  %v7400_v41 = vsel %vm6608_vm7, %v1274_v25, %v1275_v28  ;;  %v3568_v38 = vshll.u32 %v6994_v13, 16  ;;  %v6054_v44 = vld [vmem:[%s6316_s11 + $0x84] sm:$0xf] }
  0xeb   : > { %v3527_v20 = vor.u32 %v3526_v45, %v7375_v57  ;;  %v1279_v35 = vrot.slane %v6053_v31, 5  ;;  %v8443_v4 = vshrl.u32 %v6984_v49, 16  ;;  %v8444_v50 = vshll.u32 %v6984_v49, 16  ;;  %v7411_v55 = vld [vmem:[%s6316_s11 + $0x44] sm:$0x1] }
  0xec   : > { %v4816_v51 = vrot.slane %v6054_v44, 9  ;;  %v7413_v42 = vrot.slane %v3544_v22, 5  ;;  %v8445_v25 = vshrl.u32 %v6987_v58, 16  ;;  %v1286_v45 = vrot.slane %v6702_v11, 5 }
  0xed   : > { %v3537_v63 = vrot.slane %v8443_v4, 4  ;;  %v3540_v17 = vrot.slane %v8444_v50, 5  ;;  %v8446_v31 = vcombine.low %v7226_v37, %v7230_v47  ;;  %v8447_v49 = vcombine.low %v7187_v14, %v7190_v3  ;;  %v6055_v50 = vld [vmem:[%s6316_s11 + $0x8c] sm:$0x1] }
  0xee   : > { %v3550_v28 = vrot.slane %v8445_v25, 4  ;;  %v3509_v22 = vsel %vm6342_vm4, %v3504_v53, %v3508_v16  ;;  %v3518_v4 = vrot.slane %v3517_v6, 4  ;;  %v3532_v58 = vrot.slane %v3530_v18, 5 }
  0xef   : > { %5419 = vmatmul.mubr.msk.bf16.gmra.mrb[8].mxu1 %vm675_vm3, %v8446_v31  ;;  %5571 = vmatmul.mubr.msk.bf16.gmra.mrb[24].mxu0 %vm675_vm3, %v8447_v49  ;;  %v1282_v44 = vrot.slane %v6055_v50, 5  ;;  %v8448_v11 = vcombine.low %v7214_v56, %v7222_v34  ;;  %v8449_v37 = vshrl.u32 %v6991_v46, 16  ;;  %v8450_v25 = vshll.u32 %v6991_v46, 16 }
  0xf0   : > { %5422 = vmatprep.mubr.msk.bf16.mxu1 %vm675_vm3, %v4828_v10  ;;  %v7438_v49 = vrot.slane %v3568_v38, 5  ;;  %v8451_v53 = vshrl.u32 %v6994_v13, 16  ;;  %v3528_v6 = vrot.slane %v3527_v20, 4  ;;  %v1281_v18 = vrot.slane %v1279_v35, 4 }
  0xf1   : > { %5574 = vmatprep.mubr.msk.bf16.mxu0 %vm675_vm3, %v8448_v11  ;;  %v3561_v47 = vrot.slane %v8449_v37, 4  ;;  %v3564_v31 = vrot.slane %v8450_v25, 5  ;;  %v3541_v50 = vor.u32 %v3540_v17, %v3537_v63  ;;  %v3554_v10 = vshll.u32 %v7411_v55, 16 }
  0xf2   : > { %v3574_v16 = vrot.slane %v8451_v53, 4  ;;  %v3551_v11 = vor.u32 %v3550_v28, %v7413_v42  ;;  %v4817_v26 = vrot.slane %v6056_v9, 9  ;;  %v1288_v37 = vrot.slane %v1286_v45, 4 }
  0xf3   : > { %v1289_v46 = vrot.slane %v6710_v62, 5  ;;  %v5099_v25 = vcombine.low %v3475_v29, %v3485_v23  ;;  %v5100_v38 = vcombine.low %v3499_v60, %v3509_v22  ;;  %v4832_v13 = vcombine.low %v7396_v40, %v7400_v41 }
  0xf4   : > { %v3592_v20 = vshll.u32 %v7022_v7, 16  ;;  %v7454_v63 = vsel %vm6608_vm7, %v4816_v51, %v1279_v35  ;;  %v3565_v17 = vor.u32 %v3564_v31, %v3561_v47  ;;  %v3575_v28 = vor.u32 %v3574_v16, %v7438_v49 }
  0xf5   : > { %v3578_v9 = vshll.u32 %v7444_v61, 16  ;;  %v3523_v62 = vsel %vm6342_vm4, %v3518_v4, %v7375_v57  ;;  %v3533_v29 = vsel %vm6342_vm4, %v3528_v6, %v3532_v58  ;;  %v7465_v23 = vsel %vm6608_vm7, %v1281_v18, %v1282_v44  ;;  %v7484_v4 = vld [vmem:[%s6316_s11 + $0x5c] sm:$0x1]  ;;  %v6057_v18 = vld [vmem:[%s6316_s11 + $0xa0] sm:$0xf] }
  0xf6   : > { %v3542_v60 = vrot.slane %v3541_v50, 4  ;;  %v3552_v40 = vrot.slane %v3551_v11, 4  ;;  %v3556_v41 = vrot.slane %v3554_v10, 5  ;;  %v7469_v35 = vsel %vm6608_vm7, %v4817_v26, %v1286_v45 }
  0xf7   : > { %v7473_v51 = vsel %vm6608_vm7, %v1288_v37, %v1289_v46  ;;  %v8452_v57 = vcombine.low %v7281_v5, %v7294_v30  ;;  %v8453_v22 = vcombine.low %v7246_v59, %v7267_v48  ;;  %v8454_v58 = vshrl.u32 %v7019_v39, 16  ;;  %v6058_v37 = vld [vmem:[%s6316_s11 + $0x9c] sm:$0xf] }
  0xf8   : > { %v8455_v45 = vshll.u32 %v7019_v39, 16  ;;  %v7490_v47 = vrot.slane %v3592_v20, 5  ;;  %v8456_v5 = vshrl.u32 %v7022_v7, 16  ;;  %v8457_v31 = vcombine.low %v7321_v19, %v7325_v15  ;;  %v6059_v20 = vld [vmem:[%s6316_s11 + $0xa4] sm:$0x1] }
  0xf9   : > { %5423 = vmatmul.mubr.msk.bf16.gmra.mrb[12].mxu1 %vm675_vm3, %v8452_v57  ;;  %5575 = vmatmul.mubr.msk.bf16.gmra.mrb[28].mxu0 %vm675_vm3, %v8453_v22  ;;  %v3585_v26 = vrot.slane %v8454_v58, 4  ;;  %v3566_v53 = vrot.slane %v3565_v17, 4  ;;  %v3576_v16 = vrot.slane %v3575_v28, 4  ;;  %v3580_v6 = vrot.slane %v3578_v9, 5  ;;  %v8459_v57 = vld [vmem:[#allocation11_spill] sm:$0xff] }
  0xfa   : > { %v3588_v44 = vrot.slane %v8455_v45, 5  ;;  %v3598_v30 = vrot.slane %v8456_v5, 4  ;;  %5426 = vmatprep.mubr.msk.bf16.mxu1 %vm675_vm3, %v8457_v31  ;;  %5580 = vmatprep.mubr.msk.bf16.mxu0 %vm675_vm3, %v5099_v25  ;;  %v1293_v39 = vrot.slane %v6057_v18, 5  ;;  %v5101_v50 = vcombine.low %v3523_v62, %v3533_v29 }
  0xfb   : > { %v4833_v10 = vcombine.low %v7454_v63, %v7465_v23  ;;  %v3547_v7 = vsel %vm6342_vm4, %v3542_v60, %v7413_v42  ;;  %v3616_v19 = vshll.u32 %v7036_v36, 16  ;;  %v3557_v15 = vsel %vm6342_vm4, %v3552_v40, %v3556_v41  ;;  %v8458_v40 = vld [vmem:[#allocation6_spill] sm:$0xff] }
  0xfc   : > { %v4834_v11 = vcombine.low %v7469_v35, %v7473_v51  ;;  %v4818_v46 = vrot.slane %v6058_v37, 9  ;;  %v3602_v25 = vshll.u32 %v7484_v4, 16  ;;  %v1296_v17 = vrot.slane %v6059_v20, 5 }
  0xfd   : > { %v3589_v28 = vor.u32 %v3588_v44, %v3585_v26  ;;  %v3599_v9 = vor.u32 %v3598_v30, %v7490_v47  ;;  %v1300_v42 = vrot.slane %v6753_v1, 5  ;;  %v3571_v62 = vsel %vm6342_vm4, %v3566_v53, %v7438_v49  ;;  %v7534_v53 = vld [vmem:[%s6316_s11 + $0x68] sm:$0x1] }
  0xfe   : > { %v3581_v29 = vsel %vm6342_vm4, %v3576_v16, %v3580_v6  ;;  %v1295_v60 = vrot.slane %v1293_v39, 4  ;;  %v4819_v41 = vrot.slane %v8458_v40, 9  ;;  %v8460_v22 = vshrl.u32 %v8459_v57, 16  ;;  %v8463_v16 = vld [vmem:[#allocation13_spill] sm:$0xff] }
  0xff   : > { %v8461_v45 = vshll.u32 %v8459_v57, 16  ;;  %v7525_v44 = vrot.slane %v3616_v19, 5  ;;  %v8462_v1 = vshrl.u32 %v7036_v36, 16  ;;  %v5102_v30 = vcombine.low %v3547_v7, %v3557_v15  ;;  %v8465_v7 = vld [vmem:[#allocation7_spill] sm:$0xff] }
 0x100   : > { %v3609_v58 = vrot.slane %v8460_v22, 4  ;;  %v7531_v49 = vsel %vm6608_vm7, %v4818_v46, %v1293_v39  ;;  %v3604_v31 = vrot.slane %v3602_v25, 5  ;;  %v3640_v6 = vshll.u32 %v8463_v16, 16 }
 0x101   : > { %v3612_v26 = vrot.slane %v8461_v45, 5  ;;  %v3622_v5 = vrot.slane %v8462_v1, 4  ;;  %v8464_v18 = vcombine.low %v7336_v43, %v7349_v52  ;;  %5581 = vmatmul.mubr.msk.bf16.vlgmr.msra.gmra.mrb[0].mxu0 %vm675_vm3, %v5100_v38  ;;  %v3590_v19 = vrot.slane %v3589_v28, 4  ;;  %v8466_v52 = vld [vmem:[#allocation15_spill] sm:$0xff]  ;;  %v8473_v1 = vld [vmem:[#allocation14_spill] sm:$0xff] }
 0x102   : > { %v3600_v36 = vrot.slane %v3599_v9, 4  ;;  %v1302_v37 = vrot.slane %v1300_v42, 4  ;;  %v1303_v15 = vrot.slane %v8465_v7, 5  ;;  %5613 = vmatpush3.bf16.msra.mxu0 %v7387_v27  ;;  %v5103_v39 = vcombine.low %v3571_v62, %v3581_v29  ;;  %5584 = vmatprep.mubr.msk.bf16.mxu0 %vm675_vm3, %v5101_v50  ;;  %v8468_v9 = vld [vmem:[#allocation12_spill] sm:$0xff] }
 0x103   : > { %5427 = vmatmul.mubr.msk.bf16.gmra.mrb[16].mxu1 %vm675_vm3, %v8464_v18  ;;  %v7547_v46 = vsel %vm6608_vm7, %v1295_v60, %v1296_v17  ;;  %v7551_v43 = vsel %vm6608_vm7, %v4819_v41, %v1300_v42  ;;  %v3664_v38 = vshll.u32 %v8466_v52, 16  ;;  %v3613_v25 = vor.u32 %v3612_v26, %v3609_v58  ;;  %v8472_v58 = vld [vmem:[#allocation8_spill] sm:$0xff]  ;;  %v7577_v26 = vld [vmem:[%s6316_s11 + $0x74] sm:$0x1] }
 0x104   : > { %5430 = vmatprep.mubr.msk.bf16.mxu1 %vm675_vm3, %v4832_v13  ;;  %v3623_v20 = vor.u32 %v3622_v5, %v7525_v44  ;;  %v3626_v27 = vshll.u32 %v7534_v53, 16  ;;  %v8467_v13 = vld [vmem:[#allocation9_spill] sm:$0xff]  ;;  %v8469_v62 = vshrl.u32 %v8468_v9, 16  ;;  %v8470_v29 = vshll.u32 %v8468_v9, 16  ;;  %v7589_v9 = vld [vmem:[%s6316_s11 + $0x80] sm:$0x1] }
 0x105   : > { %v1307_v28 = vrot.slane %v8467_v13, 5  ;;  %v7562_v42 = vrot.slane %v3640_v6, 5  ;;  %v8471_v40 = vshrl.u32 %v8463_v16, 16  ;;  %v3595_v50 = vsel %vm6342_vm4, %v3590_v19, %v7490_v47 }
 0x106   : > { %v3633_v17 = vrot.slane %v8469_v62, 4  ;;  %v3636_v60 = vrot.slane %v8470_v29, 5  ;;  %v3605_v57 = vsel %vm6342_vm4, %v3600_v36, %v3604_v31  ;;  %v7573_v22 = vsel %vm6608_vm7, %v1302_v37, %v1303_v15  ;;  %v8477_v37 = vld [vmem:[#allocation10_spill] sm:$0xff] }
 0x107   : > { %v3646_v41 = vrot.slane %v8471_v40, 4  ;;  %v4820_v45 = vrot.slane %v8472_v58, 9  ;;  %v8474_v5 = vshrl.u32 %v8473_v1, 16  ;;  %v8475_v16 = vshll.u32 %v8473_v1, 16 }
 0x108   : > { %v7583_v7 = vrot.slane %v3664_v38, 5  ;;  %v8476_v47 = vshrl.u32 %v8466_v52, 16  ;;  %v3614_v31 = vrot.slane %v3613_v25, 4  ;;  %v3624_v36 = vrot.slane %v3623_v20, 4 }
 0x109   : > { %v3657_v6 = vrot.slane %v8474_v5, 4  ;;  %v3660_v18 = vrot.slane %v8475_v16, 5  ;;  %v3628_v13 = vrot.slane %v3626_v27, 5  ;;  %v1310_v15 = vrot.slane %v8477_v37, 5  ;;  %5585 = vmatmul.mubr.msk.bf16.gmra.mrb[4].mxu0 %vm675_vm3, %v5102_v30  ;;  %v8478_v27 = vld [vmem:[#allocation16_spill] sm:$0xff] }
 0x10a   : > { %v3670_v19 = vrot.slane %v8476_v47, 4  ;;  %v1309_v62 = vrot.slane %v1307_v28, 4  ;;  %v3637_v29 = vor.u32 %v3636_v60, %v3633_v17  ;;  %v3647_v40 = vor.u32 %v3646_v41, %v7562_v42  ;;  %5588 = vmatprep.mubr.msk.bf16.mxu0 %vm675_vm3, %v5103_v39  ;;  %v7634_v16 = vld [vmem:[%s6316_s11 + $0x8c] sm:$0x1] }
 0x10b   : > { %v3650_v58 = vshll.u32 %v7577_v26, 16  ;;  %v3778_v1 = vshll.u32 %v7187_v14, 16  ;;  %5431 = vmatmul.mubr.msk.bf16.gmra.mrb[20].mxu1 %vm675_vm3, %v4833_v10  ;;  %v4835_v52 = vcombine.low %v7531_v49, %v7547_v46  ;;  %v4836_v38 = vcombine.low %v7551_v43, %v7573_v22 }
 0x10c   : > { %v3688_v25 = vshll.u32 %v7091_v33, 16  ;;  %5434 = vmatprep.mubr.msk.bf16.mxu1 %vm675_vm3, %v4834_v11  ;;  %v5104_v63 = vcombine.low %v3595_v50, %v3605_v57  ;;  %v3661_v23 = vor.u32 %v3660_v18, %v3657_v6  ;;  %v3671_v10 = vor.u32 %v3670_v19, %v7583_v7  ;;  %v8482_v18 = vld [vmem:[#allocation17_spill] sm:$0xff] }
 0x10d   : > { %v3674_v30 = vshll.u32 %v7589_v9, 16  ;;  %v3619_v49 = vsel %vm6342_vm4, %v3614_v31, %v7525_v44  ;;  %v3629_v46 = vsel %vm6342_vm4, %v3624_v36, %v3628_v13  ;;  %v7618_v35 = vsel %vm6608_vm7, %v4820_v45, %v1307_v28 }
 0x10e   : > { %v3712_v51 = vshll.u32 %v7115_v0, 16  ;;  %v7623_v11 = vsel %vm6608_vm7, %v1309_v62, %v1310_v15  ;;  %v3638_v39 = vrot.slane %v3637_v29, 4  ;;  %v3648_v43 = vrot.slane %v3647_v40, 4  ;;  %v7651_v40 = vld [vmem:[%s6316_s11 + $0x98] sm:$0x1] }
 0x10f   : > { %v3652_v20 = vrot.slane %v3650_v58, 5  ;;  %v8479_v17 = vshrl.u32 %v8478_v27, 16  ;;  %v8480_v60 = vshll.u32 %v8478_v27, 16  ;;  %v7629_v50 = vrot.slane %v3688_v25, 5  ;;  %v6060_v25 = vld [vmem:[%s6316_s11 + $0xc] sm:$0xf] }
 0x110   : > { %v8481_v28 = vshrl.u32 %v7091_v33, 16  ;;  %v5105_v22 = vcombine.low %v3619_v49, %v3629_v46  ;;  %v3662_v45 = vrot.slane %v3661_v23, 4  ;;  %v3672_v5 = vrot.slane %v3671_v10, 4 }
 0x111   : > { %v3681_v44 = vrot.slane %v8479_v17, 4  ;;  %v3684_v41 = vrot.slane %v8480_v60, 5  ;;  %v3676_v6 = vrot.slane %v3674_v30, 5  ;;  %v8483_v47 = vshrl.u32 %v8482_v18, 16  ;;  %5589 = vmatmul.mubr.msk.bf16.gmra.mrb[8].mxu0 %vm675_vm3, %v5104_v63 }
 0x112   : > { %v3694_v57 = vrot.slane %v8481_v28, 4  ;;  %v8484_v31 = vshll.u32 %v8482_v18, 16  ;;  %v7640_v13 = vrot.slane %v3712_v51, 5  ;;  %v8485_v37 = vshrl.u32 %v7115_v0, 16  ;;  %v6061_v0 = vld [vmem:[%s6316_s11 + $0x10] sm:$0xf]  ;;  %5592 = vmatprep.mubr.msk.bf16.mxu0 %vm675_vm3, %v5105_v22 }
 0x113   : > { %v3705_v19 = vrot.slane %v8483_v47, 4  ;;  %v3788_v15 = vshrl.u32 %v7190_v3, 16  ;;  %v3643_v62 = vsel %vm6342_vm4, %v3638_v39, %v7562_v42  ;;  %v3653_v29 = vsel %vm6342_vm4, %v3648_v43, %v3652_v20  ;;  %5435 = vmatmul.mubr.msk.bf16.gmra.mrb[24].mxu1 %vm675_vm3, %v4835_v52  ;;  %v7681_v22 = vld [vmem:[%s6316_s11 + $0xa4] sm:$0x1] }
 0x114   : > { %v3708_v36 = vrot.slane %v8484_v31, 5  ;;  %v3718_v33 = vrot.slane %v8485_v37, 4  ;;  %v3736_v58 = vshll.u32 %v7144_v21, 16  ;;  %v4903_v23 = vcombine.low %v6060_v25, %v6061_v0  ;;  %5438 = vmatprep.mubr.msk.bf16.mxu1 %vm675_vm3, %v4836_v38 }
 0x115   : > { %v3685_v10 = vor.u32 %v3684_v41, %v3681_v44  ;;  %v3695_v30 = vor.u32 %v3694_v57, %v7629_v50  ;;  %v3698_v49 = vshll.u32 %v7634_v16, 16  ;;  %v4837_v42 = vcombine.low %v7618_v35, %v7623_v11 }
 0x116   : > { %v3667_v52 = vsel %vm6342_vm4, %v3662_v45, %v7583_v7  ;;  %v3677_v63 = vsel %vm6342_vm4, %v3672_v5, %v3676_v6  ;;  %v3760_v46 = vshll.u32 %v7158_v2, 16  ;;  %v5106_v51 = vcombine.low %v3643_v62, %v3653_v29 }
 0x117   : > { %v3709_v39 = vor.u32 %v3708_v36, %v3705_v19  ;;  %v3719_v43 = vor.u32 %v3718_v33, %v7640_v13  ;;  %v3722_v38 = vshll.u32 %v7651_v40, 16  ;;  %v8486_v20 = vshrl.u32 %v7141_v8, 16  ;;  %v7693_v33 = vld [vmem:[%s6316_s11 + $0xb0] sm:$0x1] }
 0x118   : > { %v8487_v35 = vshll.u32 %v7141_v8, 16  ;;  %v7676_v17 = vrot.slane %v3736_v58, 5  ;;  %v8488_v7 = vshrl.u32 %v7144_v21, 16  ;;  %v5107_v60 = vcombine.low %v3667_v52, %v3677_v63 }
 0x119   : > { %v3729_v27 = vrot.slane %v8486_v20, 4  ;;  %v3686_v41 = vrot.slane %v3685_v10, 4  ;;  %v3696_v28 = vrot.slane %v3695_v30, 4  ;;  %v3700_v57 = vrot.slane %v3698_v49, 5  ;;  %5593 = vmatmul.mubr.msk.bf16.gmra.mrb[12].mxu0 %vm675_vm3, %v5106_v51  ;;  %v6062_v10 = vld [vmem:[%s6316_s11 + $0x18] sm:$0xf] }
 0x11a   : > { %v3732_v11 = vrot.slane %v8487_v35, 5  ;;  %v3742_v44 = vrot.slane %v8488_v7, 4  ;;  %v8489_v45 = vshrl.u32 %v7153_v54, 16  ;;  %v8490_v6 = vshll.u32 %v7153_v54, 16  ;;  %5596 = vmatprep.mubr.msk.bf16.mxu0 %vm675_vm3, %v5107_v60  ;;  %v6063_v30 = vld [vmem:[%s6316_s11 + $0x1c] sm:$0xf] }
 0x11b   : > { %v7687_v8 = vrot.slane %v3760_v46, 5  ;;  %v8491_v47 = vshrl.u32 %v7158_v2, 16  ;;  %v3799_v21 = vshrl.u32 %v7214_v56, 16  ;;  %v3710_v31 = vrot.slane %v3709_v39, 4  ;;  %5439 = vmatmul.mubr.msk.bf16.gmra.mrb[28].mxu1 %vm675_vm3, %v4837_v42  ;;  %v6064_v46 = vld [vmem:[%s6316_s11 + $0x24] sm:$0xf] }
 0x11c   : > { %v3753_v5 = vrot.slane %v8489_v45, 4  ;;  %v3756_v18 = vrot.slane %v8490_v6, 5  ;;  %v3720_v36 = vrot.slane %v3719_v43, 4  ;;  %v3724_v37 = vrot.slane %v3722_v38, 5  ;;  %5444 = vmatprep.mubr.msk.bf16.mxu1 %vm675_vm3, %v4903_v23 }
 0x11d   : > { %v3766_v19 = vrot.slane %v8491_v47, 4  ;;  %v3802_v62 = vshll.u32 %v7214_v56, 16  ;;  %v3733_v29 = vor.u32 %v3732_v11, %v3729_v27  ;;  %v3743_v54 = vor.u32 %v3742_v44, %v7676_v17  ;;  %v7722_v11 = vld [vmem:[%s6316_s11 + $0xbc] sm:$0x1] }
 0x11e   : > { %v3746_v58 = vshll.u32 %v7681_v22, 16  ;;  %v3812_v2 = vshrl.u32 %v7222_v34, 16  ;;  %v3691_v25 = vsel %vm6342_vm4, %v3686_v41, %v7629_v50  ;;  %v3701_v56 = vsel %vm6342_vm4, %v3696_v28, %v3700_v57  ;;  %v6065_v50 = vld [vmem:[%s6316_s11 + $0x28] sm:$0xf] }
 0x11f   : > { %v3784_v0 = vshll.u32 %v7190_v3, 16  ;;  %v4904_v49 = vcombine.low %v6062_v10, %v6063_v30  ;;  %v3757_v42 = vor.u32 %v3756_v18, %v3753_v5  ;;  %v3767_v52 = vor.u32 %v3766_v19, %v7687_v8 }
 0x120   : > { %v3770_v63 = vshll.u32 %v7693_v33, 16  ;;  %v4905_v51 = vcombine.low %v6064_v46, %v6065_v50  ;;  %v3715_v39 = vsel %vm6342_vm4, %v3710_v31, %v7640_v13  ;;  %v3725_v23 = vsel %vm6342_vm4, %v3720_v36, %v3724_v37  ;;  %v7740_v31 = vld [vmem:[%s6316_s11 + $0xc8] sm:$0x1]  ;;  %v8493_v37 = vld [vmem:[#allocation5_spill] sm:$0xff] }
 0x121   : > { %v3808_v43 = vshll.u32 %v7222_v34, 16  ;;  %v5108_v38 = vcombine.low %v3691_v25, %v3701_v56  ;;  %v3734_v20 = vrot.slane %v3733_v29, 4  ;;  %v3744_v27 = vrot.slane %v3743_v54, 4  ;;  %v6066_v25 = vld [vmem:[%s6316_s11 + $0x30] sm:$0xf] }
 0x122   : > { %v3748_v35 = vrot.slane %v3746_v58, 5  ;;  %v8492_v7 = vshrl.u32 %v7187_v14, 16  ;;  %v3780_v60 = vrot.slane %v3778_v1, 5  ;;  %v7728_v41 = vrot.slane %v3784_v0, 5  ;;  %v6067_v56 = vld [vmem:[%s6316_s11 + $0x34] sm:$0xf] }
 0x123   : > { %v3790_v13 = vrot.slane %v3788_v15, 4  ;;  %v5109_v28 = vcombine.low %v3715_v39, %v3725_v23  ;;  %v3758_v34 = vrot.slane %v3757_v42, 4  ;;  %v3768_v57 = vrot.slane %v3767_v52, 4  ;;  %5445 = vmatmul.mubr.msk.bf16.vlgmr.msra.gmra.mrb[0].mxu1 %vm675_vm3, %v4904_v49  ;;  %5597 = vmatmul.mubr.msk.bf16.gmra.mrb[16].mxu0 %vm675_vm3, %v5108_v38  ;;  %v6068_v52 = vld [vmem:[%s6316_s11 + $0x3c] sm:$0xf] }
 0x124   : > { %v3777_v44 = vrot.slane %v8492_v7, 4  ;;  %v3772_v45 = vrot.slane %v3770_v63, 5  ;;  %v3801_v5 = vrot.slane %v3799_v21, 4  ;;  %v3804_v6 = vrot.slane %v3802_v62, 5  ;;  %5647 = vmatpush3.bf16.msra.mxu1 %v8493_v37  ;;  %5448 = vmatprep.mubr.msk.bf16.mxu1 %vm675_vm3, %v4905_v51  ;;  %v6069_v63 = vld [vmem:[%s6316_s11 + $0x40] sm:$0xf] }
 0x125   : > { %v7732_v18 = vrot.slane %v3808_v43, 5  ;;  %v3814_v47 = vrot.slane %v3812_v2, 4  ;;  %v3823_v19 = vshrl.u32 %v7246_v59, 16  ;;  %v3739_v14 = vsel %vm6342_vm4, %v3734_v20, %v7676_v17  ;;  %5600 = vmatprep.mubr.msk.bf16.mxu0 %vm675_vm3, %v5109_v28  ;;  %v7767_v20 = vld [vmem:[%s6316_s11 + $0xd4] sm:$0x1] }
 0x126   : > { %v3794_v1 = vshll.u32 %v7722_v11, 16  ;;  %v3826_v3 = vshll.u32 %v7246_v59, 16  ;;  %v3749_v15 = vsel %vm6342_vm4, %v3744_v27, %v3748_v35  ;;  %v3781_v21 = vor.u32 %v3780_v60, %v3777_v44  ;;  %v6070_v44 = vld [vmem:[%s6316_s11 + $0x1c] sm:$0xf] }
 0x127   : > { %v3791_v36 = vor.u32 %v3790_v13, %v7728_v41  ;;  %v3836_v17 = vshrl.u32 %v7267_v48, 16  ;;  %v3763_v59 = vsel %vm6342_vm4, %v3758_v34, %v7687_v8  ;;  %v3832_v62 = vshll.u32 %v7267_v48, 16  ;;  %v7778_v13 = vld [vmem:[%s6316_s11 + $0x78] sm:$0xf] }
 0x128   : > { %v3773_v29 = vsel %vm6342_vm4, %v3768_v57, %v3772_v45  ;;  %v3805_v54 = vor.u32 %v3804_v6, %v3801_v5  ;;  %v3815_v58 = vor.u32 %v3814_v47, %v7732_v18  ;;  %v3818_v2 = vshll.u32 %v7740_v31, 16  ;;  %v7787_v45 = vld [vmem:[%s6316_s11 + $0x7c] sm:$0xf] }
 0x129   : > { %v4906_v0 = vcombine.low %v6066_v25, %v6067_v56  ;;  %v5110_v10 = vcombine.low %v3739_v14, %v3749_v15  ;;  %v3796_v8 = vrot.slane %v3794_v1, 5  ;;  %v3782_v30 = vrot.slane %v3781_v21, 4  ;;  %v6074_v14 = vld [vmem:[%s6316_s11 + $0x4c] sm:$0xf]  ;;  %v6075_v15 = vld [vmem:[%s6316_s11 + $0x54] sm:$0xf] }
 0x12a   : > { %v3792_v49 = vrot.slane %v3791_v36, 4  ;;  %v3825_v48 = vrot.slane %v3823_v19, 4  ;;  %v3828_v42 = vrot.slane %v3826_v3, 5  ;;  %v4907_v46 = vcombine.low %v6068_v52, %v6069_v63  ;;  %v6073_v19 = vld [vmem:[%s6316_s11 + $0x48] sm:$0xf] }
 0x12b   : > { %v5111_v50 = vcombine.low %v3763_v59, %v3773_v29  ;;  %v7764_v51 = vrot.slane %v3832_v62, 5  ;;  %v3838_v39 = vrot.slane %v3836_v17, 4  ;;  %v3806_v23 = vrot.slane %v3805_v54, 4  ;;  %5449 = vmatmul.mubr.msk.bf16.gmra.mrb[4].mxu1 %vm675_vm3, %v4906_v0  ;;  %5601 = vmatmul.mubr.msk.bf16.gmra.mrb[20].mxu0 %vm675_vm3, %v5110_v10  ;;  %v6076_v21 = vld [vmem:[%s6316_s11 + $0x58] sm:$0xf] }
 0x12c   : > { %v3816_v43 = vrot.slane %v3815_v58, 4  ;;  %v3820_v38 = vrot.slane %v3818_v2, 5  ;;  %v3787_v27 = vsel %vm6342_vm4, %v3782_v30, %v7728_v41  ;;  %v3797_v35 = vsel %vm6342_vm4, %v3792_v49, %v3796_v8  ;;  %5452 = vmatprep.mubr.msk.bf16.mxu1 %vm675_vm3, %v4907_v46  ;;  %v6077_v17 = vld [vmem:[%s6316_s11 + $0x28] sm:$0xf]  ;;  %v6078_v62 = vld [vmem:[%s6316_s11 + $0x18] sm:$0xf] }
 0x12d   : > { %v3829_v7 = vor.u32 %v3828_v42, %v3825_v48  ;;  %v4158_v60 = vrot.slane %v6070_v44, 5  ;;  %v2201_v28 = vshrl.u32 %v7778_v13, 16  ;;  %5604 = vmatprep.mubr.msk.bf16.mxu0 %vm675_vm3, %v5111_v50  ;;  %v3839_v41 = vor.u32 %v3838_v39, %v7764_v51  ;;  %v8494_v58 = vld [vmem:[#allocation18_spill] sm:$0xff]  ;;  %v6079_v0 = vld [vmem:[%s6316_s11 + $0x34] sm:$0xf] }
 0x12e   : > { %v3842_v34 = vshll.u32 %v7767_v20, 16  ;;  %v2204_v57 = vshll.u32 %v7778_v13, 16  ;;  %v2210_v5 = vshll.u32 %v7787_v45, 16  ;;  %v3811_v6 = vsel %vm6342_vm4, %v3806_v23, %v7732_v18  ;;  %v6080_v42 = vld [vmem:[%s6316_s11 + $0x24] sm:$0xf] }
 0x12f   : > { %v3821_v47 = vsel %vm6342_vm4, %v3816_v43, %v3820_v38  ;;  %v4908_v1 = vcombine.low %v6073_v19, %v6074_v14  ;;  %v5112_v3 = vcombine.low %v3787_v27, %v3797_v35  ;;  %v4909_v36 = vcombine.low %v6075_v15, %v6076_v21  ;;  %v6081_v43 = vld [vmem:[%s6316_s11 + $0x30] sm:$0xf]  ;;  %v7852_v15 = vld [vmem:[%s6316_s11 + $0x84] sm:$0xf]  ;;  %v7855_v21 = vld [vmem:[%s6316_s11 + $0x88] sm:$0xf] }
 0x130   : > { %v4165_v37 = vrot.slane %v6077_v17, 5  ;;  %v3830_v59 = vrot.slane %v3829_v7, 4  ;;  %v5131_v29 = vrot.slane %v6078_v62, 9  ;;  %v4160_v54 = vrot.slane %v4158_v60, 4  ;;  %v6082_v7 = vld [vmem:[%s6316_s11 + $0x40] sm:$0xf] }
 0x131   : > { %v4161_v18 = vrot.slane %v8494_v58, 5  ;;  %v5113_v2 = vcombine.low %v3811_v6, %v3821_v47  ;;  %v3840_v25 = vrot.slane %v3839_v41, 4  ;;  %v3844_v56 = vrot.slane %v3842_v34, 5  ;;  %v6084_v34 = vld [vmem:[%s6316_s11 + $0x60] sm:$0xf] }
 0x132   : > { %v4172_v10 = vrot.slane %v6079_v0, 5  ;;  %v7803_v8 = vrot.slane %v2201_v28, 4  ;;  %v7805_v30 = vrot.slane %v2204_v57, 5  ;;  %v2214_v49 = vshrl.u32 %v7787_v45, 16  ;;  %v7831_v28 = vld [vmem:[%s6316_s11 + $0x80] sm:$0x1] }
 0x133   : > { %v7808_v48 = vrot.slane %v2210_v5, 5  ;;  %v5132_v52 = vrot.slane %v6080_v42, 9  ;;  %v4167_v63 = vrot.slane %v4165_v37, 4  ;;  %v4168_v46 = vrot.slane %v7308_v24, 5  ;;  %5453 = vmatmul.mubr.msk.bf16.gmra.mrb[8].mxu1 %vm675_vm3, %v4908_v1  ;;  %5605 = vmatmul.mubr.msk.bf16.gmra.mrb[24].mxu0 %vm675_vm3, %v5112_v3  ;;  %v6085_v57 = vld [vmem:[%s6316_s11 + $0x64] sm:$0xf] }
 0x134   : > { %v3835_v50 = vsel %vm6342_vm4, %v3830_v59, %v7764_v51  ;;  %v4159_v39 = vsel %vm6608_vm7, %v5131_v29, %v4158_v60  ;;  %v4162_v23 = vsel %vm6608_vm7, %v4160_v54, %v4161_v18  ;;  %v5133_v24 = vrot.slane %v6081_v43, 9  ;;  %5456 = vmatprep.mubr.msk.bf16.mxu1 %vm675_vm3, %v4909_v36  ;;  %5608 = vmatprep.mubr.msk.bf16.mxu0 %vm675_vm3, %v5113_v2  ;;  %v8495_v51 = vld [vmem:[#allocation19_spill] sm:$0xff]  ;;  %v6086_v6 = vld [vmem:[%s6316_s11 + $0x6c] sm:$0xf]  ;;  %v7838_v47 = vld [vmem:[%s6316_s11 + $0x70] sm:$0xf] }
 0x135   : > { %v3845_v38 = vsel %vm6342_vm4, %v3840_v25, %v3844_v56  ;;  %v4174_v27 = vrot.slane %v4172_v10, 4  ;;  %v4175_v35 = vrot.slane %v8495_v51, 5  ;;  %v4179_v44 = vrot.slane %v6082_v7, 5  ;;  %v6090_v62 = vld [vmem:[%s6316_s11 + $0x3c] sm:$0xf] }
 0x136   : > { %v7828_v60 = vrot.slane %v2214_v49, 4  ;;  %v2220_v41 = vshll.u32 %v7831_v28, 16  ;;  %v4910_v5 = vcombine.low %v6084_v34, %v6085_v57  ;;  %v4911_v19 = vcombine.low %v6086_v6, %v7838_v47  ;;  %v7869_v58 = vld [vmem:[%s6316_s11 + $0x94] sm:$0xf]  ;;  %v7872_v18 = vld [vmem:[%s6316_s11 + $0x90] sm:$0xf] }
 0x137   : > { %v4912_v14 = vcombine.low %v7778_v13, %v7787_v45  ;;  %v7845_v1 = vsel %vm6608_vm7, %v5132_v52, %v4165_v37  ;;  %v7849_v3 = vsel %vm6608_vm7, %v4167_v63, %v4168_v46  ;;  %v4913_v36 = vcombine.low %v7852_v15, %v7855_v21  ;;  %v7881_v63 = vld [vmem:[%s6316_s11 + $0x9c] sm:$0xf]  ;;  %v7884_v46 = vld [vmem:[%s6316_s11 + $0xa0] sm:$0xf]  ;;  %v6097_v43 = vld [vmem:[%s6316_s11 + $0x58] sm:$0xf] }
 0x138   : > { %v5114_v17 = vcombine.low %v3835_v50, %v3845_v38  ;;  %v5148_v59 = vcombine.low %v4159_v39, %v4162_v23  ;;  %v7861_v37 = vsel %vm6608_vm7, %v5133_v24, %v4172_v10  ;;  %v5134_v29 = vrot.slane %v6090_v62, 9  ;;  %v6093_v10 = vld [vmem:[%s6316_s11 + $0x4c] sm:$0xf]  ;;  %v6096_v39 = vld [vmem:[%s6316_s11 + $0x48] sm:$0xf] }
 0x139   : > { %v7866_v54 = vsel %vm6608_vm7, %v4174_v27, %v4175_v35  ;;  %v4914_v2 = vcombine.low %v7872_v18, %v7869_v58  ;;  %v4181_v25 = vrot.slane %v4179_v44, 4  ;;  %v4182_v56 = vrot.slane %v7411_v55, 5  ;;  %v6098_v24 = vld [vmem:[%s6316_s11 + $0x64] sm:$0xf]  ;;  %v6099_v7 = vld [vmem:[%s6316_s11 + $0x70] sm:$0xf] }
 0x13a   : > { %v5149_v0 = vcombine.low %v7845_v1, %v7849_v3  ;;  %v4186_v49 = vrot.slane %v6093_v10, 5  ;;  %v2177_v42 = vshrl.u32 %v6086_v6, 16  ;;  %v2180_v52 = vshll.u32 %v6086_v6, 16  ;;  %v6101_v62 = vld [vmem:[%s6316_s11 + $0x60] sm:$0xf] }
 0x13b   : > { %v4915_v50 = vcombine.low %v7881_v63, %v7884_v46  ;;  %v5135_v23 = vrot.slane %v6096_v39, 9  ;;  %v4193_v55 = vrot.slane %v6097_v43, 5  ;;  %v4200_v38 = vrot.slane %v6098_v24, 5  ;;  %5457 = vmatmul.mubr.msk.bf16.gmra.mrb[12].mxu1 %vm675_vm3, %v4910_v5  ;;  %5609 = vmatmul.mubr.msk.bf16.gmra.mrb[28].mxu0 %vm675_vm3, %v5114_v17  ;;  %v6100_v5 = vld [vmem:[%s6316_s11 + $0x54] sm:$0xf] }
 0x13c   : > { %v5150_v27 = vcombine.low %v7861_v37, %v7866_v54  ;;  %v7897_v51 = vsel %vm6608_vm7, %v5134_v29, %v4179_v44  ;;  %v4189_v35 = vrot.slane %v7444_v61, 5  ;;  %v4207_v34 = vrot.slane %v6099_v7, 5  ;;  %5460 = vmatprep.mubr.msk.bf16.mxu1 %vm675_vm3, %v4911_v19  ;;  %5614 = vmatprep.mubr.msk.bf16.mxu0 %vm675_vm3, %v5148_v59  ;;  %v6104_v10 = vld [vmem:[%s6316_s11 + $0x6c] sm:$0xf]  ;;  %v7984_v45 = vld [vmem:[%s6316_s11 + $0xc4] sm:$0xf] }
 0x13d   : > { %v7905_v57 = vsel %vm6608_vm7, %v4181_v25, %v4182_v56  ;;  %v5136_v6 = vrot.slane %v6100_v5, 9  ;;  %v2186_v44 = vshll.u32 %v7838_v47, 16  ;;  %v2190_v1 = vshrl.u32 %v7838_v47, 16  ;;  %v7914_v25 = vld [vmem:[%s6316_s11 + $0xac] sm:$0xf] }
 0x13e   : > { %v4188_v61 = vrot.slane %v4186_v49, 4  ;;  %v4196_v3 = vrot.slane %v7484_v4, 5  ;;  %v2179_v17 = vrot.slane %v2177_v42, 4  ;;  %v2182_v19 = vrot.slane %v2180_v52, 5  ;;  %v7917_v56 = vld [vmem:[%s6316_s11 + $0xa8] sm:$0xf] }
 0x13f   : > { %v4195_v37 = vrot.slane %v4193_v55, 4  ;;  %v5137_v59 = vrot.slane %v6101_v62, 9  ;;  %v4202_v29 = vrot.slane %v4200_v38, 4  ;;  %v4203_v54 = vrot.slane %v7534_v53, 5  ;;  %v7941_v62 = vld [vmem:[%s6316_s11 + $0xb4] sm:$0xf] }
 0x140   : > { %v4916_v47 = vcombine.low %v7917_v56, %v7914_v25  ;;  %v5138_v39 = vrot.slane %v6104_v10, 9  ;;  %v4209_v4 = vrot.slane %v4207_v34, 4  ;;  %v4210_v42 = vrot.slane %v7577_v26, 5  ;;  %v7938_v26 = vld [vmem:[%s6316_s11 + $0xb8] sm:$0xf] }
 0x141   : > { %v5151_v52 = vcombine.low %v7897_v51, %v7905_v57  ;;  %v7927_v43 = vsel %vm6608_vm7, %v5135_v23, %v4186_v49  ;;  %v7929_v53 = vrot.slane %v2186_v44, 5  ;;  %v2192_v24 = vrot.slane %v2190_v1, 4  ;;  %v6107_v57 = vld [vmem:[%s6316_s11 + $0x7c] sm:$0xf]  ;;  %v6108_v1 = vld [vmem:[%s6316_s11 + $0x74] sm:$0x1] }
 0x142   : > { %v4190_v7 = vsel %vm6608_vm7, %v4188_v61, %v4189_v35  ;;  %v7935_v5 = vsel %vm6608_vm7, %v5136_v6, %v4193_v55  ;;  %v4917_v49 = vcombine.low %v7941_v62, %v7938_v26  ;;  %v2183_v23 = vor.u32 %v2182_v19, %v2179_v17 }
 0x143   : > { %v7947_v51 = vsel %vm6608_vm7, %v4195_v37, %v4196_v3  ;;  %v7951_v35 = vsel %vm6608_vm7, %v5137_v59, %v4200_v38  ;;  %v7955_v55 = vsel %vm6608_vm7, %v4202_v29, %v4203_v54  ;;  %v4214_v6 = vrot.slane %v6107_v57, 5  ;;  %5461 = vmatmul.mubr.msk.bf16.gmra.mrb[16].mxu1 %vm675_vm3, %v4912_v14  ;;  %5615 = vmatmul.mubr.msk.bf16.vlgmr.msra.gmra.mrb[0].mxu0 %vm675_vm3, %v5149_v0  ;;  %v6109_v3 = vld [vmem:[%s6316_s11 + $0x78] sm:$0xf]  ;;  %v7987_v14 = vld [vmem:[%s6316_s11 + $0xc0] sm:$0xf] }
 0x144   : > { %v7965_v44 = vsel %vm6608_vm7, %v5138_v39, %v4207_v34  ;;  %v7969_v38 = vsel %vm6608_vm7, %v4209_v4, %v4210_v42  ;;  %v2196_v61 = vshll.u32 %v6108_v1, 16  ;;  %v5139_v17 = vrot.slane %v6109_v3, 9  ;;  %5464 = vmatprep.mubr.msk.bf16.mxu1 %vm675_vm3, %v4913_v36  ;;  %5618 = vmatprep.mubr.msk.bf16.mxu0 %vm675_vm3, %v5150_v27  ;;  %v6112_v4 = vld [vmem:[%s6316_s11 + $0x84] sm:$0xf]  ;;  %v6113_v57 = vld [vmem:[%s6316_s11 + $0x88] sm:$0xf] }
 0x145   : > { %v7975_v19 = vrot.slane %v2220_v41, 5  ;;  %v5152_v13 = vcombine.low %v7927_v43, %v4190_v7  ;;  %v4918_v0 = vcombine.low %v7987_v14, %v7984_v45  ;;  %v2193_v28 = vor.u32 %v2192_v24, %v7929_v53  ;;  %v6114_v1 = vld [vmem:[%s6316_s11 + $0x94] sm:$0xf] }
 0x146   : > { %v5153_v41 = vcombine.low %v7935_v5, %v7947_v51  ;;  %v7994_v34 = vrot.slane %v2183_v23, 4  ;;  %v2207_v36 = vor.u32 %v7805_v30, %v7803_v8  ;;  %v2217_v27 = vor.u32 %v7828_v60, %v7808_v48 }
 0x147   : > { %v5154_v37 = vcombine.low %v7951_v35, %v7955_v55  ;;  %v5155_v59 = vcombine.low %v7965_v44, %v7969_v38  ;;  %v4216_v29 = vrot.slane %v4214_v6, 4  ;;  %v4217_v54 = vrot.slane %v7589_v9, 5 }
 0x148   : > { %v8005_v10 = vrot.slane %v2196_v61, 5  ;;  %v8009_v39 = vsel %vm6608_vm7, %v5139_v17, %v4214_v6  ;;  %v2225_v8 = vshrl.u32 %v7852_v15, 16  ;;  %v2228_v30 = vshll.u32 %v7852_v15, 16 }
 0x149   : > { %v8013_v60 = vrot.slane %v2193_v28, 4  ;;  %v5140_v42 = vrot.slane %v6112_v4, 9  ;;  %v2234_v43 = vshll.u32 %v7855_v21, 16  ;;  %v2238_v24 = vshrl.u32 %v7855_v21, 16 }
 0x14a   : > { %v2189_v9 = vsel %vm6342_vm4, %v7994_v34, %v7929_v53  ;;  %v8022_v7 = vrot.slane %v2207_v36, 4  ;;  %v8024_v23 = vrot.slane %v2217_v27, 4  ;;  %v4221_v6 = vrot.slane %v6113_v57, 5 }
 0x14b   : > { %v8029_v15 = vsel %vm6608_vm7, %v4216_v29, %v4217_v54  ;;  %v4228_v61 = vrot.slane %v6114_v1, 5  ;;  %v2249_v3 = vshrl.u32 %v7872_v18, 16  ;;  %v2252_v21 = vshll.u32 %v7872_v18, 16  ;;  %5465 = vmatmul.mubr.msk.bf16.gmra.mrb[20].mxu1 %vm675_vm3, %v4914_v2  ;;  %5619 = vmatmul.mubr.msk.bf16.gmra.mrb[4].mxu0 %vm675_vm3, %v5151_v52  ;;  %v6115_v54 = vld [vmem:[%s6316_s11 + $0x8c] sm:$0x1] }
 0x14c   : > { %v2227_v17 = vrot.slane %v2225_v8, 4  ;;  %v2230_v28 = vrot.slane %v2228_v30, 5  ;;  %v2258_v36 = vshll.u32 %v7869_v58, 16  ;;  %v2262_v27 = vshrl.u32 %v7869_v58, 16  ;;  %5468 = vmatprep.mubr.msk.bf16.mxu1 %vm675_vm3, %v4915_v50  ;;  %5622 = vmatprep.mubr.msk.bf16.mxu0 %vm675_vm3, %v5152_v13  ;;  %v6116_v30 = vld [vmem:[%s6316_s11 + $0x90] sm:$0xf] }
 0x14d   : > { %v2199_v18 = vsel %vm6342_vm4, %v8013_v60, %v8005_v10  ;;  %v4224_v2 = vrot.slane %v7634_v16, 5  ;;  %v8051_v52 = vrot.slane %v2234_v43, 5  ;;  %v2240_v29 = vrot.slane %v2238_v24, 4 }
 0x14e   : > { %v5156_v58 = vcombine.low %v8009_v39, %v8029_v15  ;;  %v2213_v50 = vsel %vm6342_vm4, %v8022_v7, %v7808_v48  ;;  %v4223_v13 = vrot.slane %v4221_v6, 4  ;;  %v2244_v8 = vshll.u32 %v6115_v54, 16 }
 0x14f   : > { %v5141_v4 = vrot.slane %v6116_v30, 9  ;;  %v4230_v10 = vrot.slane %v4228_v61, 4  ;;  %v2251_v60 = vrot.slane %v2249_v3, 4  ;;  %v2254_v16 = vrot.slane %v2252_v21, 5  ;;  %v6117_v3 = vld [vmem:[%s6316_s11 + $0xa0] sm:$0xf] }
 0x150   : > { %v2231_v43 = vor.u32 %v2230_v28, %v2227_v17  ;;  %v4231_v24 = vrot.slane %v7651_v40, 5  ;;  %v8062_v57 = vrot.slane %v2258_v36, 5  ;;  %v2264_v1 = vrot.slane %v2262_v27, 4 }
 0x151   : > { %v2223_v48 = vsel %vm6342_vm4, %v8024_v23, %v7975_v19  ;;  %v8070_v7 = vsel %vm6608_vm7, %v5140_v42, %v4221_v6  ;;  %v2241_v54 = vor.u32 %v2240_v29, %v8051_v52  ;;  %v4235_v21 = vrot.slane %v6117_v3, 5 }
 0x152   : > { %v8076_v40 = vsel %vm6608_vm7, %v4223_v13, %v4224_v2  ;;  %v2246_v17 = vrot.slane %v2244_v8, 5  ;;  %v2273_v28 = vshrl.u32 %v7881_v63, 16  ;;  %v2276_v36 = vshll.u32 %v7881_v63, 16  ;;  %v6118_v2 = vld [vmem:[%s6316_s11 + $0x98] sm:$0x1] }
 0x153   : > { %v8082_v19 = vsel %vm6608_vm7, %v5141_v4, %v4228_v61  ;;  %v2255_v42 = vor.u32 %v2254_v16, %v2251_v60  ;;  %v2282_v23 = vshll.u32 %v7884_v46, 16  ;;  %v2286_v6 = vshrl.u32 %v7884_v46, 16  ;;  %5469 = vmatmul.mubr.msk.bf16.gmra.mrb[24].mxu1 %vm675_vm3, %v4916_v47  ;;  %5623 = vmatmul.mubr.msk.bf16.gmra.mrb[8].mxu0 %vm675_vm3, %v5153_v41  ;;  %v6119_v47 = vld [vmem:[%s6316_s11 + $0x9c] sm:$0xf]  ;;  %v6120_v60 = vld [vmem:[%s6316_s11 + $0xac] sm:$0xf] }
 0x154   : > { %v2232_v63 = vrot.slane %v2231_v43, 4  ;;  %v8096_v61 = vsel %vm6608_vm7, %v4230_v10, %v4231_v24  ;;  %v2265_v27 = vor.u32 %v2264_v1, %v8062_v57  ;;  %v2268_v29 = vshll.u32 %v6118_v2, 16  ;;  %5472 = vmatprep.mubr.msk.bf16.mxu1 %vm675_vm3, %v4917_v49  ;;  %5626 = vmatprep.mubr.msk.bf16.mxu0 %vm675_vm3, %v5154_v37  ;;  %v6121_v43 = vld [vmem:[%s6316_s11 + $0xa4] sm:$0x1] }
 0x155   : > { %v2242_v46 = vrot.slane %v2241_v54, 4  ;;  %v5142_v5 = vrot.slane %v6119_v47, 9  ;;  %v4237_v51 = vrot.slane %v4235_v21, 4  ;;  %v4238_v41 = vrot.slane %v7681_v22, 5 }
 0x156   : > { %v4944_v13 = vcombine.low %v2189_v9, %v2199_v18  ;;  %v8115_v8 = vcombine.low %v2213_v50, %v2223_v48  ;;  %v2275_v49 = vrot.slane %v2273_v28, 4  ;;  %v2278_v35 = vrot.slane %v2276_v36, 5 }
 0x157   : > { %v5157_v55 = vcombine.low %v8070_v7, %v8076_v40  ;;  %v2256_v37 = vrot.slane %v2255_v42, 4  ;;  %v8119_v30 = vrot.slane %v2282_v23, 5  ;;  %v2288_v4 = vrot.slane %v2286_v6, 4 }
 0x158   : > { %v2237_v22 = vsel %vm6342_vm4, %v2232_v63, %v8051_v52  ;;  %v5158_v53 = vcombine.low %v8082_v19, %v8096_v61  ;;  %v2266_v34 = vrot.slane %v2265_v27, 4  ;;  %v2270_v9 = vrot.slane %v2268_v29, 5 }
 0x159   : > { %v2247_v18 = vsel %vm6342_vm4, %v2242_v46, %v2246_v17  ;;  %v8130_v50 = vsel %vm6608_vm7, %v5142_v5, %v4235_v21  ;;  %v8134_v10 = vsel %vm6608_vm7, %v4237_v51, %v4238_v41  ;;  %v4242_v16 = vrot.slane %v6120_v60, 5  ;;  %v6127_v60 = vld [vmem:[%s6316_s11 + $0xc4] sm:$0xf] }
 0x15a   : > { %v2279_v52 = vor.u32 %v2278_v35, %v2275_v49  ;;  %v2292_v24 = vshll.u32 %v6121_v43, 16  ;;  %v2297_v1 = vshrl.u32 %v7917_v56, 16  ;;  %v2300_v48 = vshll.u32 %v7917_v56, 16  ;;  %v6124_v35 = vld [vmem:[%s6316_s11 + $0xb4] sm:$0xf] }
 0x15b   : > { %v2261_v54 = vsel %vm6342_vm4, %v2256_v37, %v8062_v57  ;;  %v2289_v3 = vor.u32 %v2288_v4, %v8119_v30  ;;  %v2306_v21 = vshll.u32 %v7914_v25, 16  ;;  %v2310_v17 = vshrl.u32 %v7914_v25, 16  ;;  %5473 = vmatmul.mubr.msk.bf16.gmra.mrb[28].mxu1 %vm675_vm3, %v4918_v0  ;;  %5627 = vmatmul.mubr.msk.bf16.gmra.mrb[12].mxu0 %vm675_vm3, %v5155_v59  ;;  %v6122_v57 = vld [vmem:[%s6316_s11 + $0xa8] sm:$0xf] }
 0x15c   : > { %v2271_v56 = vsel %vm6342_vm4, %v2266_v34, %v2270_v9  ;;  %v5143_v28 = vrot.slane %v6122_v57, 9  ;;  %v2321_v36 = vshrl.u32 %v7941_v62, 16  ;;  %v2324_v42 = vshll.u32 %v7941_v62, 16  ;;  %5494 = vmatprep.mubr.msk.bf16.mxu1 %vm675_vm3, %v4944_v13  ;;  %5630 = vmatprep.mubr.msk.bf16.mxu0 %vm675_vm3, %v5156_v58  ;;  %v6123_v13 = vld [vmem:[%s6316_s11 + $0xb0] sm:$0x1] }
 0x15d   : > { %v4244_v25 = vrot.slane %v4242_v16, 4  ;;  %v4245_v44 = vrot.slane %v7693_v33, 5  ;;  %v2330_v38 = vshll.u32 %v7938_v26, 16  ;;  %v2334_v0 = vshrl.u32 %v7938_v26, 16  ;;  %v6125_v34 = vld [vmem:[%s6316_s11 + $0xb8] sm:$0xf] }
 0x15e   : > { %v4946_v59 = vcombine.low %v2237_v22, %v2247_v18  ;;  %v2280_v23 = vrot.slane %v2279_v52, 4  ;;  %v2299_v6 = vrot.slane %v2297_v1, 4  ;;  %v2302_v63 = vrot.slane %v2300_v48, 5  ;;  %v6126_v18 = vld [vmem:[%s6316_s11 + $0xbc] sm:$0x1] }
 0x15f   : > { %v2290_v62 = vrot.slane %v2289_v3, 4  ;;  %v2294_v27 = vrot.slane %v2292_v24, 5  ;;  %v8167_v2 = vrot.slane %v2306_v21, 5  ;;  %v2312_v39 = vrot.slane %v2310_v17, 4  ;;  %v6128_v17 = vld [vmem:[%s6316_s11 + $0xc0] sm:$0xf] }
 0x160   : > { %v4947_v15 = vcombine.low %v2261_v54, %v2271_v56  ;;  %v5159_v33 = vcombine.low %v8130_v50, %v8134_v10  ;;  %v2323_v58 = vrot.slane %v2321_v36, 4  ;;  %v2326_v29 = vrot.slane %v2324_v42, 5 }
 0x161   : > { %v4243_v26 = vsel %vm6608_vm7, %v5143_v28, %v4242_v16  ;;  %v4246_v46 = vsel %vm6608_vm7, %v4244_v25, %v4245_v44  ;;  %v8175_v47 = vrot.slane %v2330_v38, 5  ;;  %v2336_v5 = vrot.slane %v2334_v0, 4 }
 0x162   : > { %v2285_v51 = vsel %vm6342_vm4, %v2280_v23, %v8119_v30  ;;  %v2303_v41 = vor.u32 %v2302_v63, %v2299_v6  ;;  %v2316_v49 = vshll.u32 %v6123_v13, 16  ;;  %v5144_v37 = vrot.slane %v6124_v35, 9 }
 0x163   : > { %v2295_v4 = vsel %vm6342_vm4, %v2290_v62, %v2294_v27  ;;  %v2313_v22 = vor.u32 %v2312_v39, %v8167_v2  ;;  %v4249_v9 = vrot.slane %v6125_v34, 5  ;;  %v2340_v50 = vshll.u32 %v6126_v18, 16  ;;  %5495 = vmatmul.mubr.msk.bf16.vlgmr.msra.gmra.mrb[16].mxu1 %vm675_vm3, %v8115_v8  ;;  %5631 = vmatmul.mubr.msk.bf16.gmra.mrb[16].mxu0 %vm675_vm3, %v5157_v55  ;;  %v6130_v27 = vld [vmem:[%s6316_s11 + $0xd0] sm:$0xf] }
 0x164   : > { %v5160_v30 = vcombine.low %v4243_v26, %v4246_v46  ;;  %v2327_v10 = vor.u32 %v2326_v29, %v2323_v58  ;;  %v4256_v16 = vrot.slane %v6127_v60, 5  ;;  %v2345_v52 = vshrl.u32 %v7987_v14, 16  ;;  %5498 = vmatprep.mubr.msk.bf16.mxu1 %vm675_vm3, %v4946_v59  ;;  %5634 = vmatprep.mubr.msk.bf16.mxu0 %vm675_vm3, %v5158_v53  ;;  %v6129_v59 = vld [vmem:[%s6316_s11 + $0xc8] sm:$0x1]  ;;  %v6131_v26 = vld [vmem:[%s6316_s11 + $0xcc] sm:$0xf] }
 0x165   : > { %v2337_v8 = vor.u32 %v2336_v5, %v8175_v47  ;;  %v2348_v7 = vshll.u32 %v7987_v14, 16  ;;  %v2354_v40 = vshll.u32 %v7984_v45, 16  ;;  %v2358_v55 = vshrl.u32 %v7984_v45, 16 }
 0x166   : > { %v4948_v43 = vcombine.low %v2285_v51, %v2295_v4  ;;  %v2304_v24 = vrot.slane %v2303_v41, 4  ;;  %v2318_v1 = vrot.slane %v2316_v49, 5  ;;  %v4252_v48 = vrot.slane %v7722_v11, 5 }
 0x167   : > { %v2314_v54 = vrot.slane %v2313_v22, 4  ;;  %v4251_v3 = vrot.slane %v4249_v9, 4  ;;  %v2342_v21 = vrot.slane %v2340_v50, 5  ;;  %v5145_v19 = vrot.slane %v6128_v17, 9 }
 0x168   : > { %v2328_v61 = vrot.slane %v2327_v10, 4  ;;  %v4258_v53 = vrot.slane %v4256_v16, 4  ;;  %v4259_v56 = vrot.slane %v7740_v31, 5  ;;  %v2347_v14 = vrot.slane %v2345_v52, 4 }
 0x169   : > { %v2338_v57 = vrot.slane %v2337_v8, 4  ;;  %v2350_v28 = vrot.slane %v2348_v7, 5  ;;  %v2356_v36 = vrot.slane %v2354_v40, 5  ;;  %v2360_v45 = vrot.slane %v2358_v55, 4 }
 0x16a   : > { %v2309_v42 = vsel %vm6342_vm4, %v2304_v24, %v8167_v2  ;;  %v2319_v11 = vsel %vm6342_vm4, %v2314_v54, %v2318_v1  ;;  %v4250_v25 = vsel %vm6608_vm7, %v5144_v37, %v4249_v9  ;;  %v4253_v44 = vsel %vm6608_vm7, %v4251_v3, %v4252_v48  ;;  %v8253_v24 = vld [vmem:[%s8380_s2] ss:$0 sm:$0xff] }
 0x16b   : > { %5499 = vmatmul.mubr.msk.bf16.gmra.mrb[20].mxu1 %vm675_vm3, %v4947_v15  ;;  %5635 = vmatmul.mubr.msk.bf16.gmra.mrb[20].mxu0 %vm675_vm3, %v5159_v33  ;;  %v2333_v31 = vsel %vm6342_vm4, %v2328_v61, %v8175_v47  ;;  %v4257_v38 = vsel %vm6608_vm7, %v5145_v19, %v4256_v16  ;;  %v4260_v0 = vsel %vm6608_vm7, %v4258_v53, %v4259_v56  ;;  %v2364_v23 = vshll.u32 %v6129_v59, 16 }
 0x16c   : > { %5502 = vmatprep.mubr.msk.bf16.mxu1 %vm675_vm3, %v4948_v43  ;;  %5638 = vmatprep.mubr.msk.bf16.mxu0 %vm675_vm3, %v5160_v30  ;;  %v2343_v6 = vsel %vm6342_vm4, %v2338_v57, %v2342_v21  ;;  %v2351_v63 = vor.u32 %v2350_v28, %v2347_v14  ;;  %v2361_v62 = vor.u32 %v2360_v45, %v2356_v36  ;;  %v4263_v2 = vrot.slane %v6130_v27, 5 }
 0x16d   : > { %v4949_v39 = vcombine.low %v2309_v42, %v2319_v11  ;;  %v5161_v15 = vcombine.low %v4250_v25, %v4253_v44  ;;  %v4950_v33 = vcombine.low %v2333_v31, %v2343_v6  ;;  %v5162_v58 = vcombine.low %v4257_v38, %v4260_v0 }
 0x16e   : > { %v2366_v29 = vrot.slane %v2364_v23, 5  ;;  %v5146_v46 = vrot.slane %v6131_v26, 9  ;;  %v2352_v47 = vrot.slane %v2351_v63, 4  ;;  %v2362_v5 = vrot.slane %v2361_v62, 4 }
 0x16f   : > { %v4265_v51 = vrot.slane %v4263_v2, 4  ;;  %v4266_v41 = vrot.slane %v7767_v20, 5 }
 0x170   : > { %v4264_v13 = vsel %vm6608_vm7, %v5146_v46, %v4263_v2  ;;  %v2357_v49 = vsel %vm6342_vm4, %v2352_v47, %v2356_v36  ;;  %v2367_v35 = vsel %vm6342_vm4, %v2362_v5, %v2366_v29 }
 0x171   : > { %v4267_v20 = vsel %vm6608_vm7, %v4265_v51, %v4266_v41  ;;  %v4951_v37 = vcombine.low %v2357_v49, %v2367_v35 }
 0x172   : > { %v5163_v4 = vcombine.low %v4264_v13, %v4267_v20 }
 0x173   : > { %5503 = vmatmul.mubr.msk.bf16.gmra.mrb[24].mxu1 %vm675_vm3, %v4949_v39  ;;  %5639 = vmatmul.mubr.msk.bf16.gmra.mrb[24].mxu0 %vm675_vm3, %v5161_v15 }
 0x174   : > { %5506 = vmatprep.mubr.msk.bf16.mxu1 %vm675_vm3, %v4950_v33  ;;  %5642 = vmatprep.mubr.msk.bf16.mxu0 %vm675_vm3, %v5162_v58 }
 0x17b   : > { %5507 = vmatmul.mubr.msk.bf16.gmra.mrb[28].mxu1 %vm675_vm3, %v4951_v37  ;;  %5643 = vmatmul.mubr.msk.bf16.gmra.mrb[28].mxu0 %vm675_vm3, %v5163_v4 }
 0x1f6   : > { %v5446_v22 = vpop.f32.mrb[0].mxu1 }
 0x1f7   : > { %v1825_v34 = vpop.f32.mrb[1].mxu1 }
 0x1f8   : > { %v5447_v9 = vpop.f32.mrb[2].mxu1 }
 0x1f9   : > { %v1828_v18 = vpop.f32.mrb[3].mxu1 }
 0x1fe   : > { %v5450_v50 = vpop.f32.mrb[4].mxu1 }
 0x1ff   : > { %v1841_v30 = vpop.f32.mrb[5].mxu1 }
 0x200   : > { %v5451_v10 = vpop.f32.mrb[6].mxu1 }
 0x201   : > { %v1844_v32 = vpop.f32.mrb[7].mxu1 }
 0x206   : > { %v5454_v60 = vpop.f32.mrb[8].mxu1 }
 0x207   : > { %v1857_v16 = vpop.f32.mrb[9].mxu1 }
 0x208   : > { %v5455_v12 = vpop.f32.mrb[10].mxu1 }
 0x209   : > { %v1860_v52 = vpop.f32.mrb[11].mxu1 }
 0x20e   : > { %v5458_v8 = vpop.f32.mrb[12].mxu1 }
 0x20f   : > { %v1873_v7 = vpop.f32.mrb[13].mxu1 }
 0x210   : > { %v5459_v40 = vpop.f32.mrb[14].mxu1 }
 0x211   : > { %v1876_v55 = vpop.f32.mrb[15].mxu1 }
 0x216   : > { %v5616_v43 = vpop.f32.mrb[0].mxu0 }
 0x217   : > { %v5648_v1 = vadd.f32 %v5616_v43, %v5446_v22  ;;  %v4403_v48 = vpop.f32.mrb[1].mxu0 }
 0x218   : > { %v5649_v54 = vadd.f32 %v4403_v48, %v1825_v34  ;;  %v5617_v3 = vpop.f32.mrb[2].mxu0 }
 0x219   : > { %v4571_v21 = vadd.f32 %v5648_v1, %v8253_v24  ;;  %v5650_v17 = vadd.f32 %v5617_v3, %v5447_v9  ;;  %v4406_v19 = vpop.f32.mrb[3].mxu0 }
 0x21a   : > { %v4569_v61 = vadd.f32 %v5649_v54, %v8253_v24  ;;  %v5651_v53 = vadd.f32 %v4406_v19, %v1828_v18 }
 0x21b   : > { %4603 = vst [vmem:[%s8257_s19 + $0x10] sm:$0xff] %v4571_v21  ;;  %v4572_v56 = vadd.f32 %v5650_v17, %v8253_v24 }
 0x21c   : > { %4601 = vst [vmem:[%s8257_s19] sm:$0xff] %v4569_v61  ;;  %v4570_v14 = vadd.f32 %v5651_v53, %v8253_v24 }
 0x21d   : > { %4604 = vst [vmem:[%s8257_s19 + $0x18] sm:$0xff] %v4572_v56 }
 0x21e   : > { %4602 = vst [vmem:[%s8257_s19 + $0x8] sm:$0xff] %v4570_v14  ;;  %v5620_v57 = vpop.f32.mrb[4].mxu0 }
 0x21f   : > { %v5652_v28 = vadd.f32 %v5620_v57, %v5450_v50  ;;  %v4419_v36 = vpop.f32.mrb[5].mxu0 }
 0x220   : > { %v5653_v45 = vadd.f32 %v4419_v36, %v1841_v30  ;;  %v5621_v42 = vpop.f32.mrb[6].mxu0 }
 0x221   : > { %v4575_v11 = vadd.f32 %v5652_v28, %v8253_v24  ;;  %v5654_v25 = vadd.f32 %v5621_v42, %v5451_v10  ;;  %v4422_v44 = vpop.f32.mrb[7].mxu0 }
 0x222   : > { %v4573_v31 = vadd.f32 %v5653_v45, %v8253_v24  ;;  %v5655_v38 = vadd.f32 %v4422_v44, %v1844_v32 }
 0x223   : > { %4607 = vst [vmem:[%s8257_s19 + $0x30] sm:$0xff] %v4575_v11  ;;  %v4576_v0 = vadd.f32 %v5654_v25, %v8253_v24 }
 0x224   : > { %4605 = vst [vmem:[%s8257_s19 + $0x20] sm:$0xff] %v4573_v31  ;;  %v4574_v59 = vadd.f32 %v5655_v38, %v8253_v24 }
 0x225   : > { %4608 = vst [vmem:[%s8257_s19 + $0x38] sm:$0xff] %v4576_v0 }
 0x226   : > { %4606 = vst [vmem:[%s8257_s19 + $0x28] sm:$0xff] %v4574_v59  ;;  %v5624_v23 = vpop.f32.mrb[8].mxu0 }
 0x227   : > { %v5656_v6 = vadd.f32 %v5624_v23, %v5454_v60  ;;  %v4435_v63 = vpop.f32.mrb[9].mxu0 }
 0x228   : > { %v5657_v62 = vadd.f32 %v4435_v63, %v1857_v16  ;;  %v5625_v27 = vpop.f32.mrb[10].mxu0 }
 0x229   : > { %v4579_v2 = vadd.f32 %v5656_v6, %v8253_v24  ;;  %v5658_v39 = vadd.f32 %v5625_v27, %v5455_v12  ;;  %v4438_v15 = vpop.f32.mrb[11].mxu0 }
 0x22a   : > { %v4577_v33 = vadd.f32 %v5657_v62, %v8253_v24  ;;  %v5659_v58 = vadd.f32 %v4438_v15, %v1860_v52 }
 0x22b   : > { %4611 = vst [vmem:[%s8257_s19 + $0x50] sm:$0xff] %v4579_v2  ;;  %v4580_v29 = vadd.f32 %v5658_v39, %v8253_v24 }
 0x22c   : > { %4609 = vst [vmem:[%s8257_s19 + $0x40] sm:$0xff] %v4577_v33  ;;  %v4578_v26 = vadd.f32 %v5659_v58, %v8253_v24 }
 0x22d   : > { %4612 = vst [vmem:[%s8257_s19 + $0x58] sm:$0xff] %v4580_v29 }
 0x22e   : > { %4610 = vst [vmem:[%s8257_s19 + $0x48] sm:$0xff] %v4578_v26  ;;  %v5628_v46 = vpop.f32.mrb[12].mxu0 }
 0x22f   : > { %v5660_v47 = vadd.f32 %v5628_v46, %v5458_v8  ;;  %v4451_v5 = vpop.f32.mrb[13].mxu0 }
 0x230   : > { %v5661_v51 = vadd.f32 %v4451_v5, %v1873_v7  ;;  %v5629_v41 = vpop.f32.mrb[14].mxu0 }
 0x231   : > { %v4583_v13 = vadd.f32 %v5660_v47, %v8253_v24  ;;  %v5662_v49 = vadd.f32 %v5629_v41, %v5459_v40  ;;  %v4454_v35 = vpop.f32.mrb[15].mxu0 }
 0x232   : > { %v4581_v20 = vadd.f32 %v5661_v51, %v8253_v24  ;;  %v5663_v37 = vadd.f32 %v4454_v35, %v1876_v55 }
 0x233   : > { %4615 = vst [vmem:[%s8257_s19 + $0x70] sm:$0xff] %v4583_v13  ;;  %v4584_v4 = vadd.f32 %v5662_v49, %v8253_v24 }
 0x234   : > { %4613 = vst [vmem:[%s8257_s19 + $0x60] sm:$0xff] %v4581_v20  ;;  %v4582_v22 = vadd.f32 %v5663_v37, %v8253_v24 }
 0x235   : > { %4616 = vst [vmem:[%s8257_s19 + $0x78] sm:$0xff] %v4584_v4 }
 0x236   : > { %4614 = vst [vmem:[%s8257_s19 + $0x68] sm:$0xff] %v4582_v22  ;;  %v5496_v34 = vpop.f32.mrb[16].mxu1  ;;  %v5632_v9 = vpop.f32.mrb[16].mxu0 }
 0x237   : > { %v5664_v18 = vadd.f32 %v5632_v9, %v5496_v34  ;;  %v2567_v50 = vpop.f32.mrb[17].mxu1  ;;  %v4467_v30 = vpop.f32.mrb[17].mxu0 }
 0x238   : > { %v5665_v10 = vadd.f32 %v4467_v30, %v2567_v50  ;;  %v5497_v32 = vpop.f32.mrb[18].mxu1  ;;  %v5633_v60 = vpop.f32.mrb[18].mxu0 }
 0x239   : > { %v4587_v16 = vadd.f32 %v5664_v18, %v8253_v24  ;;  %v5666_v12 = vadd.f32 %v5633_v60, %v5497_v32  ;;  %v2570_v52 = vpop.f32.mrb[19].mxu1  ;;  %v4470_v8 = vpop.f32.mrb[19].mxu0 }
 0x23a   : > { %v4585_v7 = vadd.f32 %v5665_v10, %v8253_v24  ;;  %v5667_v40 = vadd.f32 %v4470_v8, %v2570_v52 }
 0x23b   : > { %4619 = vst [vmem:[%s8257_s19 + $0x90] sm:$0xff] %v4587_v16  ;;  %v4588_v55 = vadd.f32 %v5666_v12, %v8253_v24 }
 0x23c   : > { %4617 = vst [vmem:[%s8257_s19 + $0x80] sm:$0xff] %v4585_v7  ;;  %v4586_v43 = vadd.f32 %v5667_v40, %v8253_v24 }
 0x23d   : > { %4620 = vst [vmem:[%s8257_s19 + $0x98] sm:$0xff] %v4588_v55 }
 0x23e   : > { %4618 = vst [vmem:[%s8257_s19 + $0x88] sm:$0xff] %v4586_v43  ;;  %v5500_v1 = vpop.f32.mrb[20].mxu1  ;;  %v5636_v48 = vpop.f32.mrb[20].mxu0 }
 0x23f   : > { %v5668_v54 = vadd.f32 %v5636_v48, %v5500_v1  ;;  %v2583_v3 = vpop.f32.mrb[21].mxu1  ;;  %v4483_v21 = vpop.f32.mrb[21].mxu0 }
 0x240   : > { %v5669_v17 = vadd.f32 %v4483_v21, %v2583_v3  ;;  %v5501_v19 = vpop.f32.mrb[22].mxu1  ;;  %v5637_v61 = vpop.f32.mrb[22].mxu0 }
 0x241   : > { %v4591_v53 = vadd.f32 %v5668_v54, %v8253_v24  ;;  %v5670_v56 = vadd.f32 %v5637_v61, %v5501_v19  ;;  %v2586_v14 = vpop.f32.mrb[23].mxu1  ;;  %v4486_v57 = vpop.f32.mrb[23].mxu0 }
 0x242   : > { %v4589_v28 = vadd.f32 %v5669_v17, %v8253_v24  ;;  %v5671_v36 = vadd.f32 %v4486_v57, %v2586_v14 }
 0x243   : > { %4623 = vst [vmem:[%s8257_s19 + $0xb0] sm:$0xff] %v4591_v53  ;;  %v4592_v45 = vadd.f32 %v5670_v56, %v8253_v24 }
 0x244   : > { %4621 = vst [vmem:[%s8257_s19 + $0xa0] sm:$0xff] %v4589_v28  ;;  %v4590_v42 = vadd.f32 %v5671_v36, %v8253_v24 }
 0x245   : > { %4624 = vst [vmem:[%s8257_s19 + $0xb8] sm:$0xff] %v4592_v45 }
 0x246   : > { %4622 = vst [vmem:[%s8257_s19 + $0xa8] sm:$0xff] %v4590_v42  ;;  %v5504_v11 = vpop.f32.mrb[24].mxu1  ;;  %v5640_v25 = vpop.f32.mrb[24].mxu0 }
 0x247   : > { %v5672_v44 = vadd.f32 %v5640_v25, %v5504_v11  ;;  %v2599_v31 = vpop.f32.mrb[25].mxu1  ;;  %v4499_v38 = vpop.f32.mrb[25].mxu0 }
 0x248   : > { %v5673_v0 = vadd.f32 %v4499_v38, %v2599_v31  ;;  %v5505_v59 = vpop.f32.mrb[26].mxu1  ;;  %v5641_v23 = vpop.f32.mrb[26].mxu0 }
 0x249   : > { %v4595_v6 = vadd.f32 %v5672_v44, %v8253_v24  ;;  %v5674_v63 = vadd.f32 %v5641_v23, %v5505_v59  ;;  %v2602_v62 = vpop.f32.mrb[27].mxu1  ;;  %v4502_v27 = vpop.f32.mrb[27].mxu0 }
 0x24a   : > { %v4593_v2 = vadd.f32 %v5673_v0, %v8253_v24  ;;  %v5675_v39 = vadd.f32 %v4502_v27, %v2602_v62 }
 0x24b   : > { %4627 = vst [vmem:[%s8257_s19 + $0xd0] sm:$0xff] %v4595_v6  ;;  %v4596_v15 = vadd.f32 %v5674_v63, %v8253_v24 }
 0x24c   : > { %4625 = vst [vmem:[%s8257_s19 + $0xc0] sm:$0xff] %v4593_v2  ;;  %v4594_v33 = vadd.f32 %v5675_v39, %v8253_v24 }
 0x24d   : > { %4628 = vst [vmem:[%s8257_s19 + $0xd8] sm:$0xff] %v4596_v15 }
 0x24e   : > { %4626 = vst [vmem:[%s8257_s19 + $0xc8] sm:$0xff] %v4594_v33  ;;  %v5508_v58 = vpop.f32.mrb[28].mxu1  ;;  %v5644_v29 = vpop.f32.mrb[28].mxu0 }
 0x24f   : > { %v5676_v26 = vadd.f32 %v5644_v29, %v5508_v58  ;;  %v2615_v46 = vpop.f32.mrb[29].mxu1  ;;  %v4515_v47 = vpop.f32.mrb[29].mxu0 }
 0x250   : > { %v5677_v5 = vadd.f32 %v4515_v47, %v2615_v46  ;;  %v5509_v51 = vpop.f32.mrb[30].mxu1  ;;  %v5645_v41 = vpop.f32.mrb[30].mxu0 }
 0x251   : > { %v4599_v13 = vadd.f32 %v5676_v26, %v8253_v24  ;;  %v5678_v49 = vadd.f32 %v5645_v41, %v5509_v51  ;;  %v2618_v35 = vpop.f32.mrb[31].mxu1  ;;  %v4518_v20 = vpop.f32.mrb[31].mxu0 }
 0x252   : > { %v4597_v37 = vadd.f32 %v5677_v5, %v8253_v24  ;;  %v5679_v4 = vadd.f32 %v4518_v20, %v2618_v35 }
 0x253   : > { %4631 = vst [vmem:[%s8257_s19 + $0xf0] sm:$0xff] %v4599_v13  ;;  %v4600_v22 = vadd.f32 %v5678_v49, %v8253_v24 }
 0x254   : > { %4629 = vst [vmem:[%s8257_s19 + $0xe0] sm:$0xff] %v4597_v37  ;;  %v4598_v34 = vadd.f32 %v5679_v4, %v8253_v24 }
 0x255   : > { %4632 = vst [vmem:[%s8257_s19 + $0xf8] sm:$0xff] %v4600_v22 }
 0x256   : > { %4630 = vst [vmem:[%s8257_s19 + $0xe8] sm:$0xff] %v4598_v34 }
 0x257   : > { %6145 = shalt.err (!%p6142_p5)
}
 0x258   : > { %s6146_s6 = scalar_lea.hbm %s8322_s28, 4096  ;;  %s6150_s9 = scalar_lea.hbm %s8381_s3, 8192 }
 0x259   : > { %p6147_p6 = scmp.ne.s32.totalorder %s8322_s28, %s6146_s6  ;;  %p6151_p10 = scmp.lt.u32.totalorder %s8322_s28, %s8381_s3 }
 0x25a   : > { %p6152_p11 = scmp.lt.u32.totalorder %s6150_s9, %s6146_s6  ;;  %p6154_p13 = scmp.lt.u32.totalorder %s6146_s6, %s8322_s28 }
 0x25b   : > { %p6148_p7 = pnand %p6147_p6, %p6275_p4 }
 0x25c   : > { %p6153_p12 = por %p6152_p11, %p6151_p10 }
 0x25d   : > { %p6149_p9 = pneg %p6148_p7 }
 0x25e   : > { %p6155_p0 = por %p6154_p13, %p6153_p12 }
 0x260   : > { %p6156_p1 = pnand %p6155_p0, %p6149_p9 }
 0x262   : > { %6159 = shalt.err (!%p6156_p1)
}
 0x263   : > { %s6213_s18 = smov 128   ;;  %s6214_s19 = smov 8  }
 0x264   : > { %5915 = dma.vmem_to_hbm [thread:$0]  (%p6275_p4), %s8324_s23, 4096, %s8322_s28, %s8332_s15, %s6213_s18, %s6213_s18, %s6214_s19  }
 0x265 PF: > { %p5921_p2 = scmp.ge.s32.totalorder %s6210_s17, 2  ;;  %s4665_s21 = sand.u32 1, %s6190_s12  }
 0x266   : > { %s4666_s26 = scalar_lea.sflag [#allocation3], %s4665_s21 }
 0x267   : > { %p5918_p3 = pnand %p5921_p2, %p6282_p8 }
 0x269   : > { %6185 = dma.done.wait (!%p5918_p3), %s4666_s26, 4096  }
 0x26a   : > { %6187 = vsyncadd (!%p5918_p3), %s4666_s26, 4294963200  ;;  %s16_s17 = sadd.s32 1, %s6210_s17   ;;  %s8496_s12 = smov %s6194_s13 }
 0x26b   : > { %p13_p5 = scmp.ge.s32.totalorder %s16_s17, 4   ;;  %s8497_s13 = smov %s6198_s14 }
 0x26c   : > { %s8498_s14 = smov %s6288_s25  ;;  %s8499_s15 = smov %s6206_s16 }
 0x26d   : > { %s8500_s16 = smov %s8502_s20  ;;  %15 = sbr.rel (!%p13_p5) target bundleno = 4 (0x4), region = 78 }
 0x274   :  { %4671 = vsyncpa [#allocation3], 1 }
 0x275   :  { %4673 = vsyncpa [#allocation3 + $0x1], 1 }

</bundles_post_ra>
